<compile_context>
chip_gen: v5e
topology: v5e:2x2
jax: 0.10.0
libtpu: 0.0.40
codegen_flags: <defaults>
</compile_context>

<pallas_src>
import functools

import jax
import jax.numpy as jnp
from jax.experimental import pallas as pl
from jax.experimental.pallas import tpu as pltpu


# ----------------------------------------------------------------------------
# VMEM limit: ~5/8 of physical VMEM, capped at 48 MiB (=> ~40 MiB on v7x's
# 64 MiB, 48 MiB on v5e/v6e's 128 MiB).
# ----------------------------------------------------------------------------
@functools.lru_cache(maxsize=1)
def _vmem_limit_bytes():
    try:
        cap = getattr(pltpu.get_tpu_info(), "vmem_capacity_bytes", None)
        if cap:
            return int(min(48 * 1024 * 1024, cap * 5 // 8))
    except Exception:
        pass
    return 40 * 1024 * 1024


# ----------------------------------------------------------------------------
# Tiled linear projection kernels:  o = x @ w + b   (bf16 MXU, fp32 accumulate)
# ----------------------------------------------------------------------------
def _linear_kernel_acc(x_ref, w_ref, b_ref, o_ref, acc_ref, *, cdt):
    @pl.when(pl.program_id(2) == 0)
    def _():
        acc_ref[...] = jnp.zeros_like(acc_ref)

    acc_ref[...] += jnp.dot(x_ref[...].astype(cdt), w_ref[...].astype(cdt),
                            preferred_element_type=jnp.float32)

    @pl.when(pl.program_id(2) == pl.num_programs(2) - 1)
    def _():
        o_ref[...] = (acc_ref[...] + b_ref[...]).astype(o_ref.dtype)


def _linear_kernel_single_k(x_ref, w_ref, b_ref, o_ref, *, cdt):
    # K fits in one tile: no accumulator scratch / extra VMEM round trip.
    o_ref[...] = (jnp.dot(x_ref[...].astype(cdt), w_ref[...].astype(cdt),
                          preferred_element_type=jnp.float32)
                  + b_ref[...]).astype(o_ref.dtype)


def _pick_tile(dim, target, align):
    """Largest divisor of `dim` that is <= target and a multiple of `align`;
    falls back to the full dim (legal per the block-shape rules) otherwise."""
    if dim <= target:
        return dim
    start = min(target, dim)
    start -= start % align
    for cand in range(start, align - 1, -align):
        if cand > 0 and dim % cand == 0:
            return cand
    # TODO(synk): pad to a tile multiple instead of the full-dim fallback.
    return dim


def pallas_linear(x, w, b, *, out_dtype=jnp.float32, compute_dtype=jnp.bfloat16):
    """x: (M, K), w: (K, N), b: (N,) -> (M, N) in out_dtype."""
    M, K = x.shape
    N = w.shape[1]
    tm = _pick_tile(M, 512, 8)
    tn = _pick_tile(N, 256, 128)
    tk = _pick_tile(K, 512, 128)
    grid = (M // tm, N // tn, K // tk)
    b2 = b.reshape(1, N).astype(jnp.float32)

    in_specs = [
        pl.BlockSpec((tm, tk), lambda i, j, kk: (i, kk)),
        pl.BlockSpec((tk, tn), lambda i, j, kk: (kk, j)),
        pl.BlockSpec((1, tn), lambda i, j, kk: (0, j)),
    ]
    out_spec = pl.BlockSpec((tm, tn), lambda i, j, kk: (i, j))
    cparams = pltpu.CompilerParams(
        dimension_semantics=("parallel", "parallel", "arbitrary"),
        vmem_limit_bytes=_vmem_limit_bytes())

    if grid[2] == 1:
        kernel = functools.partial(_linear_kernel_single_k, cdt=compute_dtype)
        scratch = []
    else:
        kernel = functools.partial(_linear_kernel_acc, cdt=compute_dtype)
        scratch = [pltpu.VMEM((tm, tn), jnp.float32)]

    return pl.pallas_call(
        kernel,
        out_shape=jax.ShapeDtypeStruct((M, N), out_dtype),
        grid=grid,
        in_specs=in_specs,
        out_specs=out_spec,
        scratch_shapes=scratch,
        compiler_params=cparams,
    )(x, w, b2)


# ----------------------------------------------------------------------------
# Multi-head attention core kernel (per grid step: one block of batch elements)
#   q_ref : (bb, H, Tq, Dh)   query block (shared across contexts via index_map)
#   k_ref : (bb, H, Tk, Dh)
#   v_ref : (bb, H, Tk, Dh)
#   m_ref : (bb, 1, Tk)       1.0 = padded key position
#   o_ref : (bb, Tq, E)       head-contiguous, lane-dense output
#   w_ref : (bb, Tq, Tk)      head-averaged attention weights (optional)
# ----------------------------------------------------------------------------
def _mha_core_kernel(q_ref, k_ref, v_ref, m_ref, *out_refs,
                     num_heads, scale, need_weights, block_b):
    o_ref = out_refs[0]
    w_ref = out_refs[1] if need_weights else None
    inv_h = 1.0 / num_heads
    cdt = v_ref.dtype
    scale_c = jnp.asarray(scale, q_ref.dtype)

    @pl.loop(0, block_b)
    def _(b):
        q_b = q_ref[b] * scale_c                      # (H, Tq, Dh) scale folded into q
        k_b = k_ref[b]                                # (H, Tk, Dh)
        v_b = v_ref[b]                                # (H, Tk, Dh)
        # Additive key-padding mask, computed ONCE per batch element and broadcast
        # over heads / query rows. Finite -1e30 so fully-masked rows are uniform.
        mask_add = jnp.where(m_ref[b] > 0.5, -1e30, 0.0)        # (1, Tk) f32

        # One batched (over heads) MXU matmul per batch element.
        s = jnp.einsum("hqd,hkd->hqk", q_b, k_b,
                       preferred_element_type=jnp.float32)      # (H, Tq, Tk)
        s = s + mask_add
        s_max = jnp.max(s, axis=-1, keepdims=True)
        p = jnp.exp(s - s_max)                                  # unnormalized
        denom = jnp.sum(p, axis=-1, keepdims=True)              # (H, Tq, 1)

        if need_weights:
            # Exact normalization: the weights are returned to the caller.
            p_n = p / denom
            o = jnp.einsum("hqk,hkd->hqd", p_n.astype(cdt), v_b,
                           preferred_element_type=jnp.float32)  # (H, Tq, Dh)
            # TODO(synk): Tk (= n_context) lanes < 128 -> masked store; tiny tensor.
            w_ref[b] = (jnp.sum(p_n, axis=0) * inv_h).astype(w_ref.dtype)
        else:
            # Deferred normalization: scale the (Tq, Dh) output, not (Tq, Tk) probs.
            o = jnp.einsum("hqk,hkd->hqd", p.astype(cdt), v_b,
                           preferred_element_type=jnp.float32)
            o = o * pl.reciprocal(denom, approx=True)

        o = o.astype(o_ref.dtype)
        # Assemble the full (Tq, E) row and do a single lane-dense store.
        o_ref[b] = jnp.concatenate([o[h] for h in range(num_heads)], axis=-1)


def _pick_batch_block(Bq, H, Tq, Tk, Dh, itemsize, need_weights):
    """VMEM-budget-driven batch block; keeps >=2 parallel grid steps when possible."""
    E = H * Dh
    per_b = 2 * (H * Tq * Dh * itemsize          # q (double-buffered)
                 + 2 * H * Tk * Dh * itemsize    # k + v
                 + Tk * 4                        # mask (f32)
                 + Tq * E * itemsize)            # output
    if need_weights:
        per_b += 2 * Tq * Tk * 4
    budget = _vmem_limit_bytes() // 3
    bb = max(1, min(Bq, 128, budget // max(per_b, 1)))
    if Bq >= 2:                                  # v7x: 2 TensorCores on the parallel axis
        bb = min(bb, Bq // 2)
    bb = max(bb, 1)
    while Bq % bb:
        bb -= 1
    return bb


def pallas_mha_core(q, k, v, mask, *, n_share, need_weights):
    """q: (Bq, H, Tq, Dh); k, v: (n_share*Bq, H, Tk, Dh) with effective batch laid
    out context-major (n*Bq + b, query q[b] shared across the n_share contexts);
    mask: (B_eff, 1, Tk), 1.0 = pad.

    Returns (o: (B_eff, Tq, E) in q.dtype, w: (B_eff, Tq, Tk) f32 head-avg or None).
    """
    Bq, H, Tq, Dh = q.shape
    B_eff, _, Tk, _ = k.shape
    assert B_eff == n_share * Bq
    E = H * Dh
    scale = float(Dh) ** -0.5

    bb = _pick_batch_block(Bq, H, Tq, Tk, Dh, jnp.dtype(q.dtype).itemsize,
                           need_weights)
    nb_b = Bq // bb
    grid = (nb_b, n_share)          # context axis innermost -> q block reused

    kernel = functools.partial(_mha_core_kernel, num_heads=H, scale=scale,
                               need_weights=need_weights, block_b=bb)

    kv_map = lambda i, j: (j * nb_b + i, 0, 0, 0)
    in_specs = [
        # q block index is constant along the innermost ("arbitrary") context axis,
        # so it is fetched once per batch block, not once per context.
        pl.BlockSpec((bb, H, Tq, Dh), lambda i, j: (i, 0, 0, 0)),
        pl.BlockSpec((bb, H, Tk, Dh), kv_map),
        pl.BlockSpec((bb, H, Tk, Dh), kv_map),
        pl.BlockSpec((bb, 1, Tk), lambda i, j: (j * nb_b + i, 0, 0)),
    ]
    o_shape = jax.ShapeDtypeStruct((B_eff, Tq, E), q.dtype)
    o_spec = pl.BlockSpec((bb, Tq, E), lambda i, j: (j * nb_b + i, 0, 0))
    cparams = pltpu.CompilerParams(
        dimension_semantics=("parallel", "arbitrary"),
        vmem_limit_bytes=_vmem_limit_bytes())

    if need_weights:
        w_shape = jax.ShapeDtypeStruct((B_eff, Tq, Tk), jnp.float32)
        w_spec = pl.BlockSpec((bb, Tq, Tk), lambda i, j: (j * nb_b + i, 0, 0))
        o, w = pl.pallas_call(
            kernel, out_shape=(o_shape, w_shape), grid=grid,
            in_specs=in_specs, out_specs=(o_spec, w_spec),
            compiler_params=cparams,
        )(q, k, v, mask)
        return o, w

    o = pl.pallas_call(
        kernel, out_shape=o_shape, grid=grid,
        in_specs=in_specs, out_specs=o_spec,
        compiler_params=cparams,
    )(q, k, v, mask)
    return o, None


# ----------------------------------------------------------------------------
# Pure-JAX reference (mirrors the kernel's precision policy so the comparison
# isolates kernel-lowering errors, not bf16-vs-f32 differences)
# ----------------------------------------------------------------------------
def _mha_core_ref(q, k, v, mask, *, n_share, need_weights):
    Bq, H, Tq, Dh = q.shape
    B_eff = k.shape[0]
    cdt = q.dtype
    scale_c = jnp.asarray(float(Dh) ** -0.5, cdt)
    qf = jnp.tile(q * scale_c, (n_share, 1, 1, 1))              # (B_eff, H, Tq, Dh)
    s = jnp.einsum("bhqd,bhkd->bhqk", qf, k,
                   preferred_element_type=jnp.float32)
    s = s + jnp.where(mask[:, :, None, :] > 0.5, -1e30, 0.0)
    s_max = jnp.max(s, axis=-1, keepdims=True)
    p = jnp.exp(s - s_max)
    denom = jnp.sum(p, axis=-1, keepdims=True)
    if need_weights:
        p_n = p / denom
        o = jnp.einsum("bhqk,bhkd->bhqd", p_n.astype(cdt), v,
                       preferred_element_type=jnp.float32)
        w = jnp.mean(p_n, axis=1)
    else:
        o = jnp.einsum("bhqk,bhkd->bhqd", p.astype(cdt), v,
                       preferred_element_type=jnp.float32) / denom
        w = None
    o = o.transpose(0, 2, 1, 3).reshape(B_eff, Tq, H * Dh).astype(cdt)
    return o, w


def _linear_ref(x, w, b, *, out_dtype=jnp.float32, compute_dtype=jnp.bfloat16):
    y = jnp.dot(x.astype(compute_dtype), w.astype(compute_dtype),
                preferred_element_type=jnp.float32) + b.astype(jnp.float32)
    return y.astype(out_dtype)


# ----------------------------------------------------------------------------
# HierHANAttention forward
# ----------------------------------------------------------------------------
def hier_han_attention(query, key, value, ctx_mask, key_padding_mask, params,
                       n_context, num_heads, use_pallas=True,
                       compute_dtype=jnp.bfloat16):
    T1, B, E = query.shape
    T2 = key.shape[0]
    N = n_context
    H = num_heads
    Dh = E // H
    cdt = compute_dtype

    if use_pallas:
        lin = functools.partial(pallas_linear, compute_dtype=cdt)
        attn = pallas_mha_core
    else:
        lin = functools.partial(_linear_ref, compute_dtype=cdt)
        attn = _mha_core_ref
    sp, dp = params["sent"], params["doc"]

    # ---------------- sentence-level attention (over T2, per (ctx, batch)) ----
    # Project the query ONCE; it is shared across the N contexts inside the
    # attention kernel via the 2-D (batch-block, context) grid.
    q_s = lin(query.reshape(T1 * B, E), sp["q_w"], sp["q_b"], out_dtype=cdt)
    q_s = q_s.reshape(T1, B, H, Dh).transpose(1, 2, 0, 3)          # (B, H, T1, Dh)

    k_s = lin(key.reshape(T2 * N * B, E), sp["k_w"], sp["k_b"], out_dtype=cdt)
    v_s = lin(value.reshape(T2 * N * B, E), sp["v_w"], sp["v_b"], out_dtype=cdt)
    k_s = k_s.reshape(T2, N * B, H, Dh).transpose(1, 2, 0, 3)      # (N*B, H, T2, Dh)
    v_s = v_s.reshape(T2, N * B, H, Dh).transpose(1, 2, 0, 3)

    mask_s = key_padding_mask.reshape(N * B, 1, T2).astype(jnp.float32)

    o_s, _ = attn(q_s, k_s, v_s, mask_s, n_share=N, need_weights=False)  # (N*B, T1, E)
    o_s = lin(o_s.reshape(N * B * T1, E), sp["out_w"], sp["out_b"], out_dtype=cdt)

    # rearrange sentence summaries into doc-level key/value rows: (T1*B, N, E)
    doc_kv_in = o_s.reshape(N, B, T1, E).transpose(2, 1, 0, 3).reshape(T1 * B, N, E)

    # ---------------- document-level attention (over the N contexts) ---------
    q_d = lin(query.reshape(T1 * B, E), dp["q_w"], dp["q_b"], out_dtype=cdt)
    q_d = q_d.reshape(T1 * B, 1, H, Dh).transpose(0, 2, 1, 3)      # (T1*B, H, 1, Dh)

    # doc-level k/v share the same input tensor -> fuse into one projection
    kv_w = jnp.concatenate([dp["k_w"], dp["v_w"]], axis=1)         # (E, 2E)
    kv_b = jnp.concatenate([dp["k_b"], dp["v_b"]], axis=0)         # (2E,)
    kv = lin(doc_kv_in.reshape(T1 * B * N, E), kv_w, kv_b, out_dtype=cdt)
    k_d = kv[:, :E].reshape(T1 * B, N, H, Dh).transpose(0, 2, 1, 3)  # (T1*B, H, N, Dh)
    v_d = kv[:, E:].reshape(T1 * B, N, H, Dh).transpose(0, 2, 1, 3)

    mask_d = jnp.broadcast_to((1.0 - ctx_mask.T)[None], (T1, B, N))
    mask_d = mask_d.reshape(T1 * B, 1, N).astype(jnp.float32)

    o_d, w_d = attn(q_d, k_d, v_d, mask_d, n_share=1, need_weights=True)

    final = lin(o_d.reshape(T1 * B, E), dp["out_w"], dp["out_b"],
                out_dtype=jnp.float32).reshape(T1, B, E)
    return final, w_d


# ----------------------------------------------------------------------------
# Deterministic parameter init
# ----------------------------------------------------------------------------
def init_mha_params(key, E):
    ks = jax.random.split(key, 8)
    s = 0.1
    return {
        "q_w": jax.random.normal(ks[0], (E, E), jnp.float32) * s,
        "q_b": jax.random.normal(ks[1], (E,), jnp.float32) * s,
        "k_w": jax.random.normal(ks[2], (E, E), jnp.float32) * s,
        "k_b": jax.random.normal(ks[3], (E,), jnp.float32) * s,
        "v_w": jax.random.normal(ks[4], (E, E), jnp.float32) * s,
        "v_b": jax.random.normal(ks[5], (E,), jnp.float32) * s,
        "out_w": jax.random.normal(ks[6], (E, E), jnp.float32) * s,
        "out_b": jax.random.normal(ks[7], (E,), jnp.float32) * s,
    }


if __name__ == "__main__":
    T1, T2, N_CTX, B, E, H = 4, 8, 2, 2, 32, 4

    root = jax.random.PRNGKey(0)
    k_q, k_k, k_v, k_len, k_sent, k_doc = jax.random.split(root, 6)

    query = jax.random.normal(k_q, (T1, B, E), jnp.float32)
    key = jax.random.normal(k_k, (T2, N_CTX, B, E), jnp.float32)
    value = jax.random.normal(k_v, (T2, N_CTX, B, E), jnp.float32)

    # key_padding_mask: (Nctx, B, T2), 1.0 = pad; every row has >= 4 valid keys
    lengths = jax.random.randint(k_len, (N_CTX, B), 4, T2 + 1)
    key_padding_mask = (jnp.arange(T2)[None, None, :] >= lengths[:, :, None]).astype(jnp.float32)

    # ctx_mask: (Nctx, B), 1.0 = valid context
    ctx_mask = jnp.ones((N_CTX, B), jnp.float32).at[1, 0].set(0.0)

    params = {
        "sent": init_mha_params(k_sent, E),
        "doc": init_mha_params(k_doc, E),
    }

    run = functools.partial(hier_han_attention, n_context=N_CTX, num_heads=H)

    out, attn_w = jax.jit(lambda *a: run(*a, use_pallas=True))(
        query, key, value, ctx_mask, key_padding_mask, params)
    jax.block_until_ready((out, attn_w))

    # Pure-JAX reference (same bf16/f32 precision policy) for sanity.
    ref_out, ref_w = jax.jit(lambda *a: run(*a, use_pallas=False))(
        query, key, value, ctx_mask, key_padding_mask, params)
    jax.block_until_ready((ref_out, ref_w))

    assert out.shape == (T1, B, E), out.shape
    assert attn_w.shape == (T1 * B, 1, N_CTX), attn_w.shape
    # Tolerance covers one bf16 ulp on intermediates plus the approx-reciprocal.
    assert jnp.allclose(out, ref_out, atol=5e-3, rtol=5e-3), \
        float(jnp.max(jnp.abs(out - ref_out)))
    assert jnp.allclose(attn_w, ref_w, atol=5e-3, rtol=5e-3), \
        float(jnp.max(jnp.abs(attn_w - ref_w)))

    print("KERNEL_OK")
</pallas_src>

<mosaic_0001>
module attributes {stable_mosaic.version = 11 : i64} {
  func.func @_linear_kernel_single_k(%arg0: i32, %arg1: i32, %arg2: i32, %arg3: memref<8x32xf32, #tpu.memory_space<vmem>>, %arg4: memref<32x32xf32, #tpu.memory_space<vmem>>, %arg5: memref<1x32xf32, #tpu.memory_space<vmem>>, %arg6: memref<8x32xbf16, #tpu.memory_space<vmem>>) attributes {dimension_semantics = [#tpu.dimension_semantics<parallel>, #tpu.dimension_semantics<parallel>, #tpu.dimension_semantics<arbitrary>], iteration_bounds = array<i64: 1, 1, 1>, scalar_prefetch = 0 : i64, scratch_operands = 0 : i64, tpu.core_type = #tpu.core_type<tc>, window_params = [{transform_indices = @transform_0, window_bounds = array<i64: 8, 32>}, {transform_indices = @transform_1, window_bounds = array<i64: 32, 32>}, {transform_indices = @transform_2, window_bounds = array<i64: 1, 32>}, {transform_indices = @transform_3, window_bounds = array<i64: 8, 32>}]} {
    %c0 = arith.constant 0 : index
    %c0_0 = arith.constant 0 : index
    %0 = vector.load %arg3[%c0, %c0_0] : memref<8x32xf32, #tpu.memory_space<vmem>>, vector<8x32xf32>
    %1 = arith.truncf %0 : vector<8x32xf32> to vector<8x32xbf16>
    %c0_1 = arith.constant 0 : index
    %c0_2 = arith.constant 0 : index
    %2 = vector.load %arg4[%c0_1, %c0_2] : memref<32x32xf32, #tpu.memory_space<vmem>>, vector<32x32xf32>
    %3 = arith.truncf %2 : vector<32x32xf32> to vector<32x32xbf16>
    %cst = arith.constant dense<0.000000e+00> : vector<8x32xf32>
    %4 = tpu.matmul %1, %3, %cst {dimension_numbers = #tpu.dot_dimension_numbers<[1], [0], [0], [1], [0, 0, 1, 1], [], []>} : vector<8x32xbf16>, vector<32x32xbf16>, vector<8x32xf32> -> vector<8x32xf32>
    %c0_3 = arith.constant 0 : index
    %c0_4 = arith.constant 0 : index
    %5 = vector.load %arg5[%c0_3, %c0_4] : memref<1x32xf32, #tpu.memory_space<vmem>>, vector<1x32xf32>
    %6 = vector.broadcast %5 : vector<1x32xf32> to vector<8x32xf32>
    %7 = arith.addf %4, %6 : vector<8x32xf32>
    %8 = arith.truncf %7 : vector<8x32xf32> to vector<8x32xbf16>
    %c0_5 = arith.constant 0 : index
    %c0_6 = arith.constant 0 : index
    %9 = vector.load %arg6[%c0_5, %c0_6] : memref<8x32xbf16, #tpu.memory_space<vmem>>, vector<8x32xbf16>
    tpu.vector_store %arg6[%c0_5, %c0_6], %8 {strides = array<i32>} : memref<8x32xbf16, #tpu.memory_space<vmem>>, vector<8x32xbf16>,
    return
  }
  func.func @transform_0(%arg0: i32, %arg1: i32, %arg2: i32) -> (i32, i32) {
    %c0_i32 = arith.constant 0 : i32
    return %arg0, %arg2 : i32, i32
  }
  func.func @transform_1(%arg0: i32, %arg1: i32, %arg2: i32) -> (i32, i32) {
    %c0_i32 = arith.constant 0 : i32
    return %arg2, %arg1 : i32, i32
  }
  func.func @transform_2(%arg0: i32, %arg1: i32, %arg2: i32) -> (i32, i32) {
    %c0_i32 = arith.constant 0 : i32
    %c0_i32_0 = arith.constant 0 : i32
    return %c0_i32, %arg1 : i32, i32
  }
  func.func @transform_3(%arg0: i32, %arg1: i32, %arg2: i32) -> (i32, i32) {
    %c0_i32 = arith.constant 0 : i32
    return %arg0, %arg1 : i32, i32
  }
}

module attributes {stable_mosaic.version = 11 : i64} {
  func.func @_linear_kernel_single_k(%arg0: i32, %arg1: i32, %arg2: i32, %arg3: memref<32x32xf32, #tpu.memory_space<vmem>>, %arg4: memref<32x32xf32, #tpu.memory_space<vmem>>, %arg5: memref<1x32xf32, #tpu.memory_space<vmem>>, %arg6: memref<32x32xbf16, #tpu.memory_space<vmem>>) attributes {dimension_semantics = [#tpu.dimension_semantics<parallel>, #tpu.dimension_semantics<parallel>, #tpu.dimension_semantics<arbitrary>], iteration_bounds = array<i64: 1, 1, 1>, scalar_prefetch = 0 : i64, scratch_operands = 0 : i64, tpu.core_type = #tpu.core_type<tc>, window_params = [{transform_indices = @transform_0, window_bounds = array<i64: 32, 32>}, {transform_indices = @transform_1, window_bounds = array<i64: 32, 32>}, {transform_indices = @transform_2, window_bounds = array<i64: 1, 32>}, {transform_indices = @transform_3, window_bounds = array<i64: 32, 32>}]} {
    %c0 = arith.constant 0 : index
    %c0_0 = arith.constant 0 : index
    %0 = vector.load %arg3[%c0, %c0_0] : memref<32x32xf32, #tpu.memory_space<vmem>>, vector<32x32xf32>
    %1 = arith.truncf %0 : vector<32x32xf32> to vector<32x32xbf16>
    %c0_1 = arith.constant 0 : index
    %c0_2 = arith.constant 0 : index
    %2 = vector.load %arg4[%c0_1, %c0_2] : memref<32x32xf32, #tpu.memory_space<vmem>>, vector<32x32xf32>
    %3 = arith.truncf %2 : vector<32x32xf32> to vector<32x32xbf16>
    %cst = arith.constant dense<0.000000e+00> : vector<32x32xf32>
    %4 = tpu.matmul %1, %3, %cst {dimension_numbers = #tpu.dot_dimension_numbers<[1], [0], [0], [1], [0, 0, 1, 1], [], []>} : vector<32x32xbf16>, vector<32x32xbf16>, vector<32x32xf32> -> vector<32x32xf32>
    %c0_3 = arith.constant 0 : index
    %c0_4 = arith.constant 0 : index
    %5 = vector.load %arg5[%c0_3, %c0_4] : memref<1x32xf32, #tpu.memory_space<vmem>>, vector<1x32xf32>
    %6 = vector.broadcast %5 : vector<1x32xf32> to vector<32x32xf32>
    %7 = arith.addf %4, %6 : vector<32x32xf32>
    %8 = arith.truncf %7 : vector<32x32xf32> to vector<32x32xbf16>
    %c0_5 = arith.constant 0 : index
    %c0_6 = arith.constant 0 : index
    %9 = vector.load %arg6[%c0_5, %c0_6] : memref<32x32xbf16, #tpu.memory_space<vmem>>, vector<32x32xbf16>
    tpu.vector_store %arg6[%c0_5, %c0_6], %8 {strides = array<i32>} : memref<32x32xbf16, #tpu.memory_space<vmem>>, vector<32x32xbf16>,
    return
  }
  func.func @transform_0(%arg0: i32, %arg1: i32, %arg2: i32) -> (i32, i32) {
    %c0_i32 = arith.constant 0 : i32
    return %arg0, %arg2 : i32, i32
  }
  func.func @transform_1(%arg0: i32, %arg1: i32, %arg2: i32) -> (i32, i32) {
    %c0_i32 = arith.constant 0 : i32
    return %arg2, %arg1 : i32, i32
  }
  func.func @transform_2(%arg0: i32, %arg1: i32, %arg2: i32) -> (i32, i32) {
    %c0_i32 = arith.constant 0 : i32
    %c0_i32_0 = arith.constant 0 : i32
    return %c0_i32, %arg1 : i32, i32
  }
  func.func @transform_3(%arg0: i32, %arg1: i32, %arg2: i32) -> (i32, i32) {
    %c0_i32 = arith.constant 0 : i32
    return %arg0, %arg1 : i32, i32
  }
}

module attributes {stable_mosaic.version = 11 : i64} {
  func.func @_linear_kernel_single_k(%arg0: i32, %arg1: i32, %arg2: i32, %arg3: memref<32x32xf32, #tpu.memory_space<vmem>>, %arg4: memref<32x32xf32, #tpu.memory_space<vmem>>, %arg5: memref<1x32xf32, #tpu.memory_space<vmem>>, %arg6: memref<32x32xbf16, #tpu.memory_space<vmem>>) attributes {dimension_semantics = [#tpu.dimension_semantics<parallel>, #tpu.dimension_semantics<parallel>, #tpu.dimension_semantics<arbitrary>], iteration_bounds = array<i64: 1, 1, 1>, scalar_prefetch = 0 : i64, scratch_operands = 0 : i64, tpu.core_type = #tpu.core_type<tc>, window_params = [{transform_indices = @transform_0, window_bounds = array<i64: 32, 32>}, {transform_indices = @transform_1, window_bounds = array<i64: 32, 32>}, {transform_indices = @transform_2, window_bounds = array<i64: 1, 32>}, {transform_indices = @transform_3, window_bounds = array<i64: 32, 32>}]} {
    %c0 = arith.constant 0 : index
    %c0_0 = arith.constant 0 : index
    %0 = vector.load %arg3[%c0, %c0_0] : memref<32x32xf32, #tpu.memory_space<vmem>>, vector<32x32xf32>
    %1 = arith.truncf %0 : vector<32x32xf32> to vector<32x32xbf16>
    %c0_1 = arith.constant 0 : index
    %c0_2 = arith.constant 0 : index
    %2 = vector.load %arg4[%c0_1, %c0_2] : memref<32x32xf32, #tpu.memory_space<vmem>>, vector<32x32xf32>
    %3 = arith.truncf %2 : vector<32x32xf32> to vector<32x32xbf16>
    %cst = arith.constant dense<0.000000e+00> : vector<32x32xf32>
    %4 = tpu.matmul %1, %3, %cst {dimension_numbers = #tpu.dot_dimension_numbers<[1], [0], [0], [1], [0, 0, 1, 1], [], []>} : vector<32x32xbf16>, vector<32x32xbf16>, vector<32x32xf32> -> vector<32x32xf32>
    %c0_3 = arith.constant 0 : index
    %c0_4 = arith.constant 0 : index
    %5 = vector.load %arg5[%c0_3, %c0_4] : memref<1x32xf32, #tpu.memory_space<vmem>>, vector<1x32xf32>
    %6 = vector.broadcast %5 : vector<1x32xf32> to vector<32x32xf32>
    %7 = arith.addf %4, %6 : vector<32x32xf32>
    %8 = arith.truncf %7 : vector<32x32xf32> to vector<32x32xbf16>
    %c0_5 = arith.constant 0 : index
    %c0_6 = arith.constant 0 : index
    %9 = vector.load %arg6[%c0_5, %c0_6] : memref<32x32xbf16, #tpu.memory_space<vmem>>, vector<32x32xbf16>
    tpu.vector_store %arg6[%c0_5, %c0_6], %8 {strides = array<i32>} : memref<32x32xbf16, #tpu.memory_space<vmem>>, vector<32x32xbf16>,
    return
  }
  func.func @transform_0(%arg0: i32, %arg1: i32, %arg2: i32) -> (i32, i32) {
    %c0_i32 = arith.constant 0 : i32
    return %arg0, %arg2 : i32, i32
  }
  func.func @transform_1(%arg0: i32, %arg1: i32, %arg2: i32) -> (i32, i32) {
    %c0_i32 = arith.constant 0 : i32
    return %arg2, %arg1 : i32, i32
  }
  func.func @transform_2(%arg0: i32, %arg1: i32, %arg2: i32) -> (i32, i32) {
    %c0_i32 = arith.constant 0 : i32
    %c0_i32_0 = arith.constant 0 : i32
    return %c0_i32, %arg1 : i32, i32
  }
  func.func @transform_3(%arg0: i32, %arg1: i32, %arg2: i32) -> (i32, i32) {
    %c0_i32 = arith.constant 0 : i32
    return %arg0, %arg1 : i32, i32
  }
}

module attributes {stable_mosaic.version = 11 : i64} {
  func.func @_mha_core_kernel(%arg0: i32, %arg1: i32, %arg2: memref<1x4x4x8xbf16, #tpu.memory_space<vmem>>, %arg3: memref<1x4x8x8xbf16, #tpu.memory_space<vmem>>, %arg4: memref<1x4x8x8xbf16, #tpu.memory_space<vmem>>, %arg5: memref<1x1x8xf32, #tpu.memory_space<vmem>>, %arg6: memref<1x4x32xbf16, #tpu.memory_space<vmem>>) attributes {dimension_semantics = [#tpu.dimension_semantics<parallel>, #tpu.dimension_semantics<arbitrary>], iteration_bounds = array<i64: 2, 2>, scalar_prefetch = 0 : i64, scratch_operands = 0 : i64, tpu.core_type = #tpu.core_type<tc>, window_params = [{transform_indices = @transform_0, window_bounds = array<i64: 1, 4, 4, 8>}, {transform_indices = @transform_1, window_bounds = array<i64: 1, 4, 8, 8>}, {transform_indices = @transform_2, window_bounds = array<i64: 1, 4, 8, 8>}, {transform_indices = @transform_3, window_bounds = array<i64: 1, 1, 8>}, {transform_indices = @transform_4, window_bounds = array<i64: 1, 4, 32>}]} {
    %cst = arith.constant 3.535160e-01 : bf16
    %c0_i32 = arith.constant 0 : i32
    %c1_i32 = arith.constant 1 : i32
    %0 = arith.muli %c0_i32, %c1_i32 : i32
    %c0_i32_0 = arith.constant 0 : i32
    %1 = arith.addi %c0_i32_0, %0 : i32
    %2 = arith.index_cast %1 : i32 to index
    %c0 = arith.constant 0 : index
    %c0_1 = arith.constant 0 : index
    %c0_2 = arith.constant 0 : index
    %3 = vector.load %arg2[%2, %c0, %c0_1, %c0_2] : memref<1x4x4x8xbf16, #tpu.memory_space<vmem>>, vector<1x4x4x8xbf16>
    %4 = vector.shape_cast %3 : vector<1x4x4x8xbf16> to vector<4x4x8xbf16>
    %5 = vector.broadcast %cst : bf16 to vector<4x4x8xbf16>
    %6 = arith.mulf %4, %5 : vector<4x4x8xbf16>
    %7 = arith.index_cast %1 : i32 to index
    %c0_3 = arith.constant 0 : index
    %c0_4 = arith.constant 0 : index
    %c0_5 = arith.constant 0 : index
    %8 = vector.load %arg3[%7, %c0_3, %c0_4, %c0_5] : memref<1x4x8x8xbf16, #tpu.memory_space<vmem>>, vector<1x4x8x8xbf16>
    %9 = vector.shape_cast %8 : vector<1x4x8x8xbf16> to vector<4x8x8xbf16>
    %10 = arith.index_cast %1 : i32 to index
    %c0_6 = arith.constant 0 : index
    %c0_7 = arith.constant 0 : index
    %c0_8 = arith.constant 0 : index
    %11 = vector.load %arg4[%10, %c0_6, %c0_7, %c0_8] : memref<1x4x8x8xbf16, #tpu.memory_space<vmem>>, vector<1x4x8x8xbf16>
    %12 = vector.shape_cast %11 : vector<1x4x8x8xbf16> to vector<4x8x8xbf16>
    %13 = arith.index_cast %1 : i32 to index
    %c0_9 = arith.constant 0 : index
    %c0_10 = arith.constant 0 : index
    %14 = vector.load %arg5[%13, %c0_9, %c0_10] : memref<1x1x8xf32, #tpu.memory_space<vmem>>, vector<1x1x8xf32>
    %15 = vector.shape_cast %14 : vector<1x1x8xf32> to vector<1x8xf32>
    %cst_11 = arith.constant 5.000000e-01 : f32
    %16 = vector.broadcast %cst_11 : f32 to vector<1x8xf32>
    %17 = arith.cmpf ogt, %15, %16 : vector<1x8xf32>
    %cst_12 = arith.constant -1.000000e+30 : f32
    %cst_13 = arith.constant 0.000000e+00 : f32
    %18 = vector.broadcast %cst_12 : f32 to vector<1x8xf32>
    %19 = vector.broadcast %cst_13 : f32 to vector<1x8xf32>
    %20 = arith.select %17, %18, %19 : vector<1x8xi1>, vector<1x8xf32>
    "tpu.trace_start"() <{level = 10 : i32, message = "hqd,hkd->hqk"}> : () -> ()
    %cst_14 = arith.constant dense<0.000000e+00> : vector<4x4x8xf32>
    %21 = tpu.matmul %6, %9, %cst_14 {dimension_numbers = #tpu.dot_dimension_numbers<[2], [2], [1], [1], [0, 0, 0, 1, 1, 1], [0], [0]>} : vector<4x4x8xbf16>, vector<4x8x8xbf16>, vector<4x4x8xf32> -> vector<4x4x8xf32>
    "tpu.trace_stop"() : () -> ()
    %22 = vector.shape_cast %20 : vector<1x8xf32> to vector<1x1x8xf32>
    %23 = vector.broadcast %22 : vector<1x1x8xf32> to vector<4x4x8xf32>
    %24 = arith.addf %21, %23 : vector<4x4x8xf32>
    %cst_15 = arith.constant dense<0xFF800000> : vector<4x4xf32>
    %25 = vector.multi_reduction <maximumf>, %24, %cst_15 [2] : vector<4x4x8xf32> to vector<4x4xf32>
    %26 = vector.shape_cast %25 : vector<4x4xf32> to vector<4x4x1xf32>
    %27 = vector.broadcast %26 : vector<4x4x1xf32> to vector<4x4x8xf32>
    %28 = arith.subf %24, %27 : vector<4x4x8xf32>
    %29 = math.exp %28 : vector<4x4x8xf32>
    %cst_16 = arith.constant dense<0.000000e+00> : vector<4x4xf32>
    %30 = vector.multi_reduction <add>, %29, %cst_16 [2] : vector<4x4x8xf32> to vector<4x4xf32>
    %31 = vector.shape_cast %30 : vector<4x4xf32> to vector<4x4x1xf32>
    %32 = arith.truncf %29 : vector<4x4x8xf32> to vector<4x4x8xbf16>
    "tpu.trace_start"() <{level = 10 : i32, message = "hqk,hkd->hqd"}> : () -> ()
    %cst_17 = arith.constant dense<0.000000e+00> : vector<4x4x8xf32>
    %33 = tpu.matmul %32, %12, %cst_17 {dimension_numbers = #tpu.dot_dimension_numbers<[2], [1], [1], [2], [0, 0, 0, 1, 1, 2], [0], [0]>} : vector<4x4x8xbf16>, vector<4x8x8xbf16>, vector<4x4x8xf32> -> vector<4x4x8xf32>
    "tpu.trace_stop"() : () -> ()
    %34 = tpu.reciprocal %31 {approx = true} : vector<4x4x1xf32> -> vector<4x4x1xf32>
    %35 = vector.broadcast %34 : vector<4x4x1xf32> to vector<4x4x8xf32>
    %36 = arith.mulf %33, %35 : vector<4x4x8xf32>
    %37 = arith.truncf %36 : vector<4x4x8xf32> to vector<4x4x8xbf16>
    %38 = vector.extract_strided_slice %37 {offsets = [0, 0, 0], sizes = [1, 4, 8], strides = [1, 1, 1]} : vector<4x4x8xbf16> to vector<1x4x8xbf16>
    %39 = vector.shape_cast %38 : vector<1x4x8xbf16> to vector<4x8xbf16>
    %40 = vector.extract_strided_slice %37 {offsets = [1, 0, 0], sizes = [1, 4, 8], strides = [1, 1, 1]} : vector<4x4x8xbf16> to vector<1x4x8xbf16>
    %41 = vector.shape_cast %40 : vector<1x4x8xbf16> to vector<4x8xbf16>
    %42 = vector.extract_strided_slice %37 {offsets = [2, 0, 0], sizes = [1, 4, 8], strides = [1, 1, 1]} : vector<4x4x8xbf16> to vector<1x4x8xbf16>
    %43 = vector.shape_cast %42 : vector<1x4x8xbf16> to vector<4x8xbf16>
    %44 = vector.extract_strided_slice %37 {offsets = [3, 0, 0], sizes = [1, 4, 8], strides = [1, 1, 1]} : vector<4x4x8xbf16> to vector<1x4x8xbf16>
    %45 = vector.shape_cast %44 : vector<1x4x8xbf16> to vector<4x8xbf16>
    %46 = tpu.concatenate %39, %41, %43, %45 in 1 : vector<4x8xbf16>, vector<4x8xbf16>, vector<4x8xbf16>, vector<4x8xbf16> -> vector<4x32xbf16>
    %47 = arith.index_cast %1 : i32 to index
    %c0_18 = arith.constant 0 : index
    %c0_19 = arith.constant 0 : index
    %48 = vector.load %arg6[%47, %c0_18, %c0_19] : memref<1x4x32xbf16, #tpu.memory_space<vmem>>, vector<1x4x32xbf16>
    %49 = vector.shape_cast %48 : vector<1x4x32xbf16> to vector<4x32xbf16>
    %50 = vector.shape_cast %46 : vector<4x32xbf16> to vector<1x4x32xbf16>
    tpu.vector_store %arg6[%47, %c0_18, %c0_19], %50 {strides = array<i32>} : memref<1x4x32xbf16, #tpu.memory_space<vmem>>, vector<1x4x32xbf16>,
    %c1_i32_20 = arith.constant 1 : i32
    return
  }
  func.func @transform_0(%arg0: i32, %arg1: i32) -> (i32, i32, i32, i32) {
    %c0_i32 = arith.constant 0 : i32
    %c0_i32_0 = arith.constant 0 : i32
    %c0_i32_1 = arith.constant 0 : i32
    %c0_i32_2 = arith.constant 0 : i32
    return %arg0, %c0_i32, %c0_i32_0, %c0_i32_1 : i32, i32, i32, i32
  }
  func.func @transform_1(%arg0: i32, %arg1: i32) -> (i32, i32, i32, i32) {
    %c2_i32 = arith.constant 2 : i32
    %0 = arith.muli %arg1, %c2_i32 : i32
    %1 = arith.addi %0, %arg0 : i32
    %c0_i32 = arith.constant 0 : i32
    %c0_i32_0 = arith.constant 0 : i32
    %c0_i32_1 = arith.constant 0 : i32
    %c0_i32_2 = arith.constant 0 : i32
    return %1, %c0_i32, %c0_i32_0, %c0_i32_1 : i32, i32, i32, i32
  }
  func.func @transform_2(%arg0: i32, %arg1: i32) -> (i32, i32, i32, i32) {
    %c2_i32 = arith.constant 2 : i32
    %0 = arith.muli %arg1, %c2_i32 : i32
    %1 = arith.addi %0, %arg0 : i32
    %c0_i32 = arith.constant 0 : i32
    %c0_i32_0 = arith.constant 0 : i32
    %c0_i32_1 = arith.constant 0 : i32
    %c0_i32_2 = arith.constant 0 : i32
    return %1, %c0_i32, %c0_i32_0, %c0_i32_1 : i32, i32, i32, i32
  }
  func.func @transform_3(%arg0: i32, %arg1: i32) -> (i32, i32, i32) {
    %c2_i32 = arith.constant 2 : i32
    %0 = arith.muli %arg1, %c2_i32 : i32
    %1 = arith.addi %0, %arg0 : i32
    %c0_i32 = arith.constant 0 : i32
    %c0_i32_0 = arith.constant 0 : i32
    %c0_i32_1 = arith.constant 0 : i32
    return %1, %c0_i32, %c0_i32_0 : i32, i32, i32
  }
  func.func @transform_4(%arg0: i32, %arg1: i32) -> (i32, i32, i32) {
    %c2_i32 = arith.constant 2 : i32
    %0 = arith.muli %arg1, %c2_i32 : i32
    %1 = arith.addi %0, %arg0 : i32
    %c0_i32 = arith.constant 0 : i32
    %c0_i32_0 = arith.constant 0 : i32
    %c0_i32_1 = arith.constant 0 : i32
    return %1, %c0_i32, %c0_i32_0 : i32, i32, i32
  }
}

module attributes {stable_mosaic.version = 11 : i64} {
  func.func @_linear_kernel_single_k(%arg0: i32, %arg1: i32, %arg2: i32, %arg3: memref<16x32xbf16, #tpu.memory_space<vmem>>, %arg4: memref<32x32xf32, #tpu.memory_space<vmem>>, %arg5: memref<1x32xf32, #tpu.memory_space<vmem>>, %arg6: memref<16x32xbf16, #tpu.memory_space<vmem>>) attributes {dimension_semantics = [#tpu.dimension_semantics<parallel>, #tpu.dimension_semantics<parallel>, #tpu.dimension_semantics<arbitrary>], iteration_bounds = array<i64: 1, 1, 1>, scalar_prefetch = 0 : i64, scratch_operands = 0 : i64, tpu.core_type = #tpu.core_type<tc>, window_params = [{transform_indices = @transform_0, window_bounds = array<i64: 16, 32>}, {transform_indices = @transform_1, window_bounds = array<i64: 32, 32>}, {transform_indices = @transform_2, window_bounds = array<i64: 1, 32>}, {transform_indices = @transform_3, window_bounds = array<i64: 16, 32>}]} {
    %c0 = arith.constant 0 : index
    %c0_0 = arith.constant 0 : index
    %0 = vector.load %arg3[%c0, %c0_0] : memref<16x32xbf16, #tpu.memory_space<vmem>>, vector<16x32xbf16>
    %c0_1 = arith.constant 0 : index
    %c0_2 = arith.constant 0 : index
    %1 = vector.load %arg4[%c0_1, %c0_2] : memref<32x32xf32, #tpu.memory_space<vmem>>, vector<32x32xf32>
    %2 = arith.truncf %1 : vector<32x32xf32> to vector<32x32xbf16>
    %cst = arith.constant dense<0.000000e+00> : vector<16x32xf32>
    %3 = tpu.matmul %0, %2, %cst {dimension_numbers = #tpu.dot_dimension_numbers<[1], [0], [0], [1], [0, 0, 1, 1], [], []>} : vector<16x32xbf16>, vector<32x32xbf16>, vector<16x32xf32> -> vector<16x32xf32>
    %c0_3 = arith.constant 0 : index
    %c0_4 = arith.constant 0 : index
    %4 = vector.load %arg5[%c0_3, %c0_4] : memref<1x32xf32, #tpu.memory_space<vmem>>, vector<1x32xf32>
    %5 = vector.broadcast %4 : vector<1x32xf32> to vector<16x32xf32>
    %6 = arith.addf %3, %5 : vector<16x32xf32>
    %7 = arith.truncf %6 : vector<16x32xf32> to vector<16x32xbf16>
    %c0_5 = arith.constant 0 : index
    %c0_6 = arith.constant 0 : index
    %8 = vector.load %arg6[%c0_5, %c0_6] : memref<16x32xbf16, #tpu.memory_space<vmem>>, vector<16x32xbf16>
    tpu.vector_store %arg6[%c0_5, %c0_6], %7 {strides = array<i32>} : memref<16x32xbf16, #tpu.memory_space<vmem>>, vector<16x32xbf16>,
    return
  }
  func.func @transform_0(%arg0: i32, %arg1: i32, %arg2: i32) -> (i32, i32) {
    %c0_i32 = arith.constant 0 : i32
    return %arg0, %arg2 : i32, i32
  }
  func.func @transform_1(%arg0: i32, %arg1: i32, %arg2: i32) -> (i32, i32) {
    %c0_i32 = arith.constant 0 : i32
    return %arg2, %arg1 : i32, i32
  }
  func.func @transform_2(%arg0: i32, %arg1: i32, %arg2: i32) -> (i32, i32) {
    %c0_i32 = arith.constant 0 : i32
    %c0_i32_0 = arith.constant 0 : i32
    return %c0_i32, %arg1 : i32, i32
  }
  func.func @transform_3(%arg0: i32, %arg1: i32, %arg2: i32) -> (i32, i32) {
    %c0_i32 = arith.constant 0 : i32
    return %arg0, %arg1 : i32, i32
  }
}

module attributes {stable_mosaic.version = 11 : i64} {
  func.func @_linear_kernel_single_k(%arg0: i32, %arg1: i32, %arg2: i32, %arg3: memref<16x32xbf16, #tpu.memory_space<vmem>>, %arg4: memref<32x64xf32, #tpu.memory_space<vmem>>, %arg5: memref<1x64xf32, #tpu.memory_space<vmem>>, %arg6: memref<16x64xbf16, #tpu.memory_space<vmem>>) attributes {dimension_semantics = [#tpu.dimension_semantics<parallel>, #tpu.dimension_semantics<parallel>, #tpu.dimension_semantics<arbitrary>], iteration_bounds = array<i64: 1, 1, 1>, scalar_prefetch = 0 : i64, scratch_operands = 0 : i64, tpu.core_type = #tpu.core_type<tc>, window_params = [{transform_indices = @transform_0, window_bounds = array<i64: 16, 32>}, {transform_indices = @transform_1, window_bounds = array<i64: 32, 64>}, {transform_indices = @transform_2, window_bounds = array<i64: 1, 64>}, {transform_indices = @transform_3, window_bounds = array<i64: 16, 64>}]} {
    %c0 = arith.constant 0 : index
    %c0_0 = arith.constant 0 : index
    %0 = vector.load %arg3[%c0, %c0_0] : memref<16x32xbf16, #tpu.memory_space<vmem>>, vector<16x32xbf16>
    %c0_1 = arith.constant 0 : index
    %c0_2 = arith.constant 0 : index
    %1 = vector.load %arg4[%c0_1, %c0_2] : memref<32x64xf32, #tpu.memory_space<vmem>>, vector<32x64xf32>
    %2 = arith.truncf %1 : vector<32x64xf32> to vector<32x64xbf16>
    %cst = arith.constant dense<0.000000e+00> : vector<16x64xf32>
    %3 = tpu.matmul %0, %2, %cst {dimension_numbers = #tpu.dot_dimension_numbers<[1], [0], [0], [1], [0, 0, 1, 1], [], []>} : vector<16x32xbf16>, vector<32x64xbf16>, vector<16x64xf32> -> vector<16x64xf32>
    %c0_3 = arith.constant 0 : index
    %c0_4 = arith.constant 0 : index
    %4 = vector.load %arg5[%c0_3, %c0_4] : memref<1x64xf32, #tpu.memory_space<vmem>>, vector<1x64xf32>
    %5 = vector.broadcast %4 : vector<1x64xf32> to vector<16x64xf32>
    %6 = arith.addf %3, %5 : vector<16x64xf32>
    %7 = arith.truncf %6 : vector<16x64xf32> to vector<16x64xbf16>
    %c0_5 = arith.constant 0 : index
    %c0_6 = arith.constant 0 : index
    %8 = vector.load %arg6[%c0_5, %c0_6] : memref<16x64xbf16, #tpu.memory_space<vmem>>, vector<16x64xbf16>
    tpu.vector_store %arg6[%c0_5, %c0_6], %7 {strides = array<i32>} : memref<16x64xbf16, #tpu.memory_space<vmem>>, vector<16x64xbf16>,
    return
  }
  func.func @transform_0(%arg0: i32, %arg1: i32, %arg2: i32) -> (i32, i32) {
    %c0_i32 = arith.constant 0 : i32
    return %arg0, %arg2 : i32, i32
  }
  func.func @transform_1(%arg0: i32, %arg1: i32, %arg2: i32) -> (i32, i32) {
    %c0_i32 = arith.constant 0 : i32
    return %arg2, %arg1 : i32, i32
  }
  func.func @transform_2(%arg0: i32, %arg1: i32, %arg2: i32) -> (i32, i32) {
    %c0_i32 = arith.constant 0 : i32
    %c0_i32_0 = arith.constant 0 : i32
    return %c0_i32, %arg1 : i32, i32
  }
  func.func @transform_3(%arg0: i32, %arg1: i32, %arg2: i32) -> (i32, i32) {
    %c0_i32 = arith.constant 0 : i32
    return %arg0, %arg1 : i32, i32
  }
}

module attributes {stable_mosaic.version = 11 : i64} {
  func.func @_linear_kernel_single_k(%arg0: i32, %arg1: i32, %arg2: i32, %arg3: memref<8x32xf32, #tpu.memory_space<vmem>>, %arg4: memref<32x32xf32, #tpu.memory_space<vmem>>, %arg5: memref<1x32xf32, #tpu.memory_space<vmem>>, %arg6: memref<8x32xbf16, #tpu.memory_space<vmem>>) attributes {dimension_semantics = [#tpu.dimension_semantics<parallel>, #tpu.dimension_semantics<parallel>, #tpu.dimension_semantics<arbitrary>], iteration_bounds = array<i64: 1, 1, 1>, scalar_prefetch = 0 : i64, scratch_operands = 0 : i64, tpu.core_type = #tpu.core_type<tc>, window_params = [{transform_indices = @transform_0, window_bounds = array<i64: 8, 32>}, {transform_indices = @transform_1, window_bounds = array<i64: 32, 32>}, {transform_indices = @transform_2, window_bounds = array<i64: 1, 32>}, {transform_indices = @transform_3, window_bounds = array<i64: 8, 32>}]} {
    %c0 = arith.constant 0 : index
    %c0_0 = arith.constant 0 : index
    %0 = vector.load %arg3[%c0, %c0_0] : memref<8x32xf32, #tpu.memory_space<vmem>>, vector<8x32xf32>
    %1 = arith.truncf %0 : vector<8x32xf32> to vector<8x32xbf16>
    %c0_1 = arith.constant 0 : index
    %c0_2 = arith.constant 0 : index
    %2 = vector.load %arg4[%c0_1, %c0_2] : memref<32x32xf32, #tpu.memory_space<vmem>>, vector<32x32xf32>
    %3 = arith.truncf %2 : vector<32x32xf32> to vector<32x32xbf16>
    %cst = arith.constant dense<0.000000e+00> : vector<8x32xf32>
    %4 = tpu.matmul %1, %3, %cst {dimension_numbers = #tpu.dot_dimension_numbers<[1], [0], [0], [1], [0, 0, 1, 1], [], []>} : vector<8x32xbf16>, vector<32x32xbf16>, vector<8x32xf32> -> vector<8x32xf32>
    %c0_3 = arith.constant 0 : index
    %c0_4 = arith.constant 0 : index
    %5 = vector.load %arg5[%c0_3, %c0_4] : memref<1x32xf32, #tpu.memory_space<vmem>>, vector<1x32xf32>
    %6 = vector.broadcast %5 : vector<1x32xf32> to vector<8x32xf32>
    %7 = arith.addf %4, %6 : vector<8x32xf32>
    %8 = arith.truncf %7 : vector<8x32xf32> to vector<8x32xbf16>
    %c0_5 = arith.constant 0 : index
    %c0_6 = arith.constant 0 : index
    %9 = vector.load %arg6[%c0_5, %c0_6] : memref<8x32xbf16, #tpu.memory_space<vmem>>, vector<8x32xbf16>
    tpu.vector_store %arg6[%c0_5, %c0_6], %8 {strides = array<i32>} : memref<8x32xbf16, #tpu.memory_space<vmem>>, vector<8x32xbf16>,
    return
  }
  func.func @transform_0(%arg0: i32, %arg1: i32, %arg2: i32) -> (i32, i32) {
    %c0_i32 = arith.constant 0 : i32
    return %arg0, %arg2 : i32, i32
  }
  func.func @transform_1(%arg0: i32, %arg1: i32, %arg2: i32) -> (i32, i32) {
    %c0_i32 = arith.constant 0 : i32
    return %arg2, %arg1 : i32, i32
  }
  func.func @transform_2(%arg0: i32, %arg1: i32, %arg2: i32) -> (i32, i32) {
    %c0_i32 = arith.constant 0 : i32
    %c0_i32_0 = arith.constant 0 : i32
    return %c0_i32, %arg1 : i32, i32
  }
  func.func @transform_3(%arg0: i32, %arg1: i32, %arg2: i32) -> (i32, i32) {
    %c0_i32 = arith.constant 0 : i32
    return %arg0, %arg1 : i32, i32
  }
}

module attributes {stable_mosaic.version = 11 : i64} {
  func.func @_linear_kernel_single_k(%arg0: i32, %arg1: i32, %arg2: i32, %arg3: memref<8x32xbf16, #tpu.memory_space<vmem>>, %arg4: memref<32x32xf32, #tpu.memory_space<vmem>>, %arg5: memref<1x32xf32, #tpu.memory_space<vmem>>, %arg6: memref<8x32xf32, #tpu.memory_space<vmem>>) attributes {dimension_semantics = [#tpu.dimension_semantics<parallel>, #tpu.dimension_semantics<parallel>, #tpu.dimension_semantics<arbitrary>], iteration_bounds = array<i64: 1, 1, 1>, scalar_prefetch = 0 : i64, scratch_operands = 0 : i64, tpu.core_type = #tpu.core_type<tc>, window_params = [{transform_indices = @transform_0, window_bounds = array<i64: 8, 32>}, {transform_indices = @transform_1, window_bounds = array<i64: 32, 32>}, {transform_indices = @transform_2, window_bounds = array<i64: 1, 32>}, {transform_indices = @transform_3, window_bounds = array<i64: 8, 32>}]} {
    %c0 = arith.constant 0 : index
    %c0_0 = arith.constant 0 : index
    %0 = vector.load %arg3[%c0, %c0_0] : memref<8x32xbf16, #tpu.memory_space<vmem>>, vector<8x32xbf16>
    %c0_1 = arith.constant 0 : index
    %c0_2 = arith.constant 0 : index
    %1 = vector.load %arg4[%c0_1, %c0_2] : memref<32x32xf32, #tpu.memory_space<vmem>>, vector<32x32xf32>
    %2 = arith.truncf %1 : vector<32x32xf32> to vector<32x32xbf16>
    %cst = arith.constant dense<0.000000e+00> : vector<8x32xf32>
    %3 = tpu.matmul %0, %2, %cst {dimension_numbers = #tpu.dot_dimension_numbers<[1], [0], [0], [1], [0, 0, 1, 1], [], []>} : vector<8x32xbf16>, vector<32x32xbf16>, vector<8x32xf32> -> vector<8x32xf32>
    %c0_3 = arith.constant 0 : index
    %c0_4 = arith.constant 0 : index
    %4 = vector.load %arg5[%c0_3, %c0_4] : memref<1x32xf32, #tpu.memory_space<vmem>>, vector<1x32xf32>
    %5 = vector.broadcast %4 : vector<1x32xf32> to vector<8x32xf32>
    %6 = arith.addf %3, %5 : vector<8x32xf32>
    %c0_5 = arith.constant 0 : index
    %c0_6 = arith.constant 0 : index
    %7 = vector.load %arg6[%c0_5, %c0_6] : memref<8x32xf32, #tpu.memory_space<vmem>>, vector<8x32xf32>
    tpu.vector_store %arg6[%c0_5, %c0_6], %6 {strides = array<i32>} : memref<8x32xf32, #tpu.memory_space<vmem>>, vector<8x32xf32>,
    return
  }
  func.func @transform_0(%arg0: i32, %arg1: i32, %arg2: i32) -> (i32, i32) {
    %c0_i32 = arith.constant 0 : i32
    return %arg0, %arg2 : i32, i32
  }
  func.func @transform_1(%arg0: i32, %arg1: i32, %arg2: i32) -> (i32, i32) {
    %c0_i32 = arith.constant 0 : i32
    return %arg2, %arg1 : i32, i32
  }
  func.func @transform_2(%arg0: i32, %arg1: i32, %arg2: i32) -> (i32, i32) {
    %c0_i32 = arith.constant 0 : i32
    %c0_i32_0 = arith.constant 0 : i32
    return %c0_i32, %arg1 : i32, i32
  }
  func.func @transform_3(%arg0: i32, %arg1: i32, %arg2: i32) -> (i32, i32) {
    %c0_i32 = arith.constant 0 : i32
    return %arg0, %arg1 : i32, i32
  }
}

module attributes {stable_mosaic.version = 11 : i64} {
  func.func @_mha_core_kernel(%arg0: i32, %arg1: i32, %arg2: memref<4x4x1x8xbf16, #tpu.memory_space<vmem>>, %arg3: memref<4x4x2x8xbf16, #tpu.memory_space<vmem>>, %arg4: memref<4x4x2x8xbf16, #tpu.memory_space<vmem>>, %arg5: memref<4x1x2xf32, #tpu.memory_space<vmem>>, %arg6: memref<4x1x32xbf16, #tpu.memory_space<vmem>>, %arg7: memref<4x1x2xf32, #tpu.memory_space<vmem>>) attributes {dimension_semantics = [#tpu.dimension_semantics<parallel>, #tpu.dimension_semantics<arbitrary>], iteration_bounds = array<i64: 2, 1>, scalar_prefetch = 0 : i64, scratch_operands = 0 : i64, tpu.core_type = #tpu.core_type<tc>, window_params = [{transform_indices = @transform_0, window_bounds = array<i64: 4, 4, 1, 8>}, {transform_indices = @transform_1, window_bounds = array<i64: 4, 4, 2, 8>}, {transform_indices = @transform_2, window_bounds = array<i64: 4, 4, 2, 8>}, {transform_indices = @transform_3, window_bounds = array<i64: 4, 1, 2>}, {transform_indices = @transform_4, window_bounds = array<i64: 4, 1, 32>}, {transform_indices = @transform_5, window_bounds = array<i64: 4, 1, 2>}]} {
    %cst = arith.constant 3.535160e-01 : bf16
    %c0_i32 = arith.constant 0 : i32
    %c4_i32 = arith.constant 4 : i32
    %0 = arith.addi %c0_i32, %c4_i32 : i32
    %c1_i32 = arith.constant 1 : i32
    scf.for %arg8 = %c0_i32 to %0 step %c1_i32  : i32 {
      %c1_i32_1 = arith.constant 1 : i32
      %1 = arith.muli %arg8, %c1_i32_1 : i32
      %c0_i32_2 = arith.constant 0 : i32
      %2 = arith.addi %c0_i32_2, %1 : i32
      %3 = arith.index_cast %2 : i32 to index
      %c0 = arith.constant 0 : index
      %c0_3 = arith.constant 0 : index
      %c0_4 = arith.constant 0 : index
      %4 = vector.load %arg2[%3, %c0, %c0_3, %c0_4] : memref<4x4x1x8xbf16, #tpu.memory_space<vmem>>, vector<1x4x1x8xbf16>
      %5 = vector.shape_cast %4 : vector<1x4x1x8xbf16> to vector<4x1x8xbf16>
      %6 = vector.broadcast %cst : bf16 to vector<4x1x8xbf16>
      %7 = arith.mulf %5, %6 : vector<4x1x8xbf16>
      %8 = arith.index_cast %2 : i32 to index
      %c0_5 = arith.constant 0 : index
      %c0_6 = arith.constant 0 : index
      %c0_7 = arith.constant 0 : index
      %9 = vector.load %arg3[%8, %c0_5, %c0_6, %c0_7] : memref<4x4x2x8xbf16, #tpu.memory_space<vmem>>, vector<1x4x2x8xbf16>
      %10 = vector.shape_cast %9 : vector<1x4x2x8xbf16> to vector<4x2x8xbf16>
      %11 = arith.index_cast %2 : i32 to index
      %c0_8 = arith.constant 0 : index
      %c0_9 = arith.constant 0 : index
      %c0_10 = arith.constant 0 : index
      %12 = vector.load %arg4[%11, %c0_8, %c0_9, %c0_10] : memref<4x4x2x8xbf16, #tpu.memory_space<vmem>>, vector<1x4x2x8xbf16>
      %13 = vector.shape_cast %12 : vector<1x4x2x8xbf16> to vector<4x2x8xbf16>
      %14 = arith.index_cast %2 : i32 to index
      %c0_11 = arith.constant 0 : index
      %c0_12 = arith.constant 0 : index
      %15 = vector.load %arg5[%14, %c0_11, %c0_12] : memref<4x1x2xf32, #tpu.memory_space<vmem>>, vector<1x1x2xf32>
      %16 = vector.shape_cast %15 : vector<1x1x2xf32> to vector<1x2xf32>
      %cst_13 = arith.constant 5.000000e-01 : f32
      %17 = vector.broadcast %cst_13 : f32 to vector<1x2xf32>
      %18 = arith.cmpf ogt, %16, %17 : vector<1x2xf32>
      %cst_14 = arith.constant -1.000000e+30 : f32
      %cst_15 = arith.constant 0.000000e+00 : f32
      %19 = vector.broadcast %cst_14 : f32 to vector<1x2xf32>
      %20 = vector.broadcast %cst_15 : f32 to vector<1x2xf32>
      %21 = arith.select %18, %19, %20 : vector<1x2xi1>, vector<1x2xf32>
      "tpu.trace_start"() <{level = 10 : i32, message = "hqd,hkd->hqk"}> : () -> ()
      %cst_16 = arith.constant dense<0.000000e+00> : vector<4x1x2xf32>
      %22 = tpu.matmul %7, %10, %cst_16 {dimension_numbers = #tpu.dot_dimension_numbers<[2], [2], [1], [1], [0, 0, 0, 1, 1, 1], [0], [0]>} : vector<4x1x8xbf16>, vector<4x2x8xbf16>, vector<4x1x2xf32> -> vector<4x1x2xf32>
      "tpu.trace_stop"() : () -> ()
      %23 = vector.shape_cast %21 : vector<1x2xf32> to vector<1x1x2xf32>
      %24 = vector.broadcast %23 : vector<1x1x2xf32> to vector<4x1x2xf32>
      %25 = arith.addf %22, %24 : vector<4x1x2xf32>
      %cst_17 = arith.constant dense<0xFF800000> : vector<4x1xf32>
      %26 = vector.multi_reduction <maximumf>, %25, %cst_17 [2] : vector<4x1x2xf32> to vector<4x1xf32>
      %27 = vector.shape_cast %26 : vector<4x1xf32> to vector<4x1x1xf32>
      %28 = vector.broadcast %27 : vector<4x1x1xf32> to vector<4x1x2xf32>
      %29 = arith.subf %25, %28 : vector<4x1x2xf32>
      %30 = math.exp %29 : vector<4x1x2xf32>
      %cst_18 = arith.constant dense<0.000000e+00> : vector<4x1xf32>
      %31 = vector.multi_reduction <add>, %30, %cst_18 [2] : vector<4x1x2xf32> to vector<4x1xf32>
      %32 = vector.shape_cast %31 : vector<4x1xf32> to vector<4x1x1xf32>
      %33 = vector.broadcast %32 : vector<4x1x1xf32> to vector<4x1x2xf32>
      %34 = arith.divf %30, %33 : vector<4x1x2xf32>
      %35 = arith.truncf %34 : vector<4x1x2xf32> to vector<4x1x2xbf16>
      "tpu.trace_start"() <{level = 10 : i32, message = "hqk,hkd->hqd"}> : () -> ()
      %cst_19 = arith.constant dense<0.000000e+00> : vector<4x1x8xf32>
      %36 = tpu.matmul %35, %13, %cst_19 {dimension_numbers = #tpu.dot_dimension_numbers<[2], [1], [1], [2], [0, 0, 0, 1, 1, 2], [0], [0]>} : vector<4x1x2xbf16>, vector<4x2x8xbf16>, vector<4x1x8xf32> -> vector<4x1x8xf32>
      "tpu.trace_stop"() : () -> ()
      %cst_20 = arith.constant dense<0.000000e+00> : vector<1x2xf32>
      %37 = vector.multi_reduction <add>, %34, %cst_20 [0] : vector<4x1x2xf32> to vector<1x2xf32>
      %cst_21 = arith.constant 2.500000e-01 : f32
      %38 = vector.broadcast %cst_21 : f32 to vector<1x2xf32>
      %39 = arith.mulf %37, %38 : vector<1x2xf32>
      %40 = arith.index_cast %2 : i32 to index
      %c0_22 = arith.constant 0 : index
      %c0_23 = arith.constant 0 : index
      %41 = vector.load %arg7[%40, %c0_22, %c0_23] : memref<4x1x2xf32, #tpu.memory_space<vmem>>, vector<1x1x2xf32>
      %42 = vector.shape_cast %41 : vector<1x1x2xf32> to vector<1x2xf32>
      %43 = vector.shape_cast %39 : vector<1x2xf32> to vector<1x1x2xf32>
      tpu.vector_store %arg7[%40, %c0_22, %c0_23], %43 {strides = array<i32>} : memref<4x1x2xf32, #tpu.memory_space<vmem>>, vector<1x1x2xf32>,
      %44 = arith.truncf %36 : vector<4x1x8xf32> to vector<4x1x8xbf16>
      %45 = vector.extract_strided_slice %44 {offsets = [0, 0, 0], sizes = [1, 1, 8], strides = [1, 1, 1]} : vector<4x1x8xbf16> to vector<1x1x8xbf16>
      %46 = vector.shape_cast %45 : vector<1x1x8xbf16> to vector<1x8xbf16>
      %47 = vector.extract_strided_slice %44 {offsets = [1, 0, 0], sizes = [1, 1, 8], strides = [1, 1, 1]} : vector<4x1x8xbf16> to vector<1x1x8xbf16>
      %48 = vector.shape_cast %47 : vector<1x1x8xbf16> to vector<1x8xbf16>
      %49 = vector.extract_strided_slice %44 {offsets = [2, 0, 0], sizes = [1, 1, 8], strides = [1, 1, 1]} : vector<4x1x8xbf16> to vector<1x1x8xbf16>
      %50 = vector.shape_cast %49 : vector<1x1x8xbf16> to vector<1x8xbf16>
      %51 = vector.extract_strided_slice %44 {offsets = [3, 0, 0], sizes = [1, 1, 8], strides = [1, 1, 1]} : vector<4x1x8xbf16> to vector<1x1x8xbf16>
      %52 = vector.shape_cast %51 : vector<1x1x8xbf16> to vector<1x8xbf16>
      %53 = tpu.concatenate %46, %48, %50, %52 in 1 : vector<1x8xbf16>, vector<1x8xbf16>, vector<1x8xbf16>, vector<1x8xbf16> -> vector<1x32xbf16>
      %54 = arith.index_cast %2 : i32 to index
      %c0_24 = arith.constant 0 : index
      %c0_25 = arith.constant 0 : index
      %55 = vector.load %arg6[%54, %c0_24, %c0_25] : memref<4x1x32xbf16, #tpu.memory_space<vmem>>, vector<1x1x32xbf16>
      %56 = vector.shape_cast %55 : vector<1x1x32xbf16> to vector<1x32xbf16>
      %57 = vector.shape_cast %53 : vector<1x32xbf16> to vector<1x1x32xbf16>
      tpu.vector_store %arg6[%54, %c0_24, %c0_25], %57 {strides = array<i32>} : memref<4x1x32xbf16, #tpu.memory_space<vmem>>, vector<1x1x32xbf16>,
    }
    %c4_i32_0 = arith.constant 4 : i32
    return
  }
  func.func @transform_0(%arg0: i32, %arg1: i32) -> (i32, i32, i32, i32) {
    %c0_i32 = arith.constant 0 : i32
    %c0_i32_0 = arith.constant 0 : i32
    %c0_i32_1 = arith.constant 0 : i32
    %c0_i32_2 = arith.constant 0 : i32
    return %arg0, %c0_i32, %c0_i32_0, %c0_i32_1 : i32, i32, i32, i32
  }
  func.func @transform_1(%arg0: i32, %arg1: i32) -> (i32, i32, i32, i32) {
    %c2_i32 = arith.constant 2 : i32
    %0 = arith.muli %arg1, %c2_i32 : i32
    %1 = arith.addi %0, %arg0 : i32
    %c0_i32 = arith.constant 0 : i32
    %c0_i32_0 = arith.constant 0 : i32
    %c0_i32_1 = arith.constant 0 : i32
    %c0_i32_2 = arith.constant 0 : i32
    return %1, %c0_i32, %c0_i32_0, %c0_i32_1 : i32, i32, i32, i32
  }
  func.func @transform_2(%arg0: i32, %arg1: i32) -> (i32, i32, i32, i32) {
    %c2_i32 = arith.constant 2 : i32
    %0 = arith.muli %arg1, %c2_i32 : i32
    %1 = arith.addi %0, %arg0 : i32
    %c0_i32 = arith.constant 0 : i32
    %c0_i32_0 = arith.constant 0 : i32
    %c0_i32_1 = arith.constant 0 : i32
    %c0_i32_2 = arith.constant 0 : i32
    return %1, %c0_i32, %c0_i32_0, %c0_i32_1 : i32, i32, i32, i32
  }
  func.func @transform_3(%arg0: i32, %arg1: i32) -> (i32, i32, i32) {
    %c2_i32 = arith.constant 2 : i32
    %0 = arith.muli %arg1, %c2_i32 : i32
    %1 = arith.addi %0, %arg0 : i32
    %c0_i32 = arith.constant 0 : i32
    %c0_i32_0 = arith.constant 0 : i32
    %c0_i32_1 = arith.constant 0 : i32
    return %1, %c0_i32, %c0_i32_0 : i32, i32, i32
  }
  func.func @transform_4(%arg0: i32, %arg1: i32) -> (i32, i32, i32) {
    %c2_i32 = arith.constant 2 : i32
    %0 = arith.muli %arg1, %c2_i32 : i32
    %1 = arith.addi %0, %arg0 : i32
    %c0_i32 = arith.constant 0 : i32
    %c0_i32_0 = arith.constant 0 : i32
    %c0_i32_1 = arith.constant 0 : i32
    return %1, %c0_i32, %c0_i32_0 : i32, i32, i32
  }
  func.func @transform_5(%arg0: i32, %arg1: i32) -> (i32, i32, i32) {
    %c2_i32 = arith.constant 2 : i32
    %0 = arith.muli %arg1, %c2_i32 : i32
    %1 = arith.addi %0, %arg0 : i32
    %c0_i32 = arith.constant 0 : i32
    %c0_i32_0 = arith.constant 0 : i32
    %c0_i32_1 = arith.constant 0 : i32
    return %1, %c0_i32, %c0_i32_0 : i32, i32, i32
  }
}

</mosaic_0001>

<bundles_post_ra>
// kernel: _lambda_.9
= control target key start
LH: loop header
LB: loop body
LE: loop exit
PB: predicated region body
PF: predicated region fallthrough
CT: control target
= control target key end

     0   :  { %8 = vsyncpa [#allocation3], 0  ;;  %s99_s15 = smov [#allocation2]   ;;  %s100_s17 = smov 128   ;;  %s134_s0 = inlined_call_operand.vmem [shape: f32[8,32], index: 0, kind: input, shape index: {}]   ;;  %s135_s1 = inlined_call_operand.hbm [shape: f32[32,32], index: 1, kind: input, shape index: {}]   ;;  %s136_s2 = inlined_call_operand.vmem [shape: f32[1,32], index: 2, kind: input, shape index: {}]   ;;  %s137_s3 = inlined_call_operand.vmem [shape: bf16[8,32], index: 3, kind: output, shape index: {}]  }
   0x1   :  { %s15_s14 = sshll.u32 %s135_s1, 4  ;;  %s17_s16 = sshll.u32 %s99_s15, 4  ;;  %s16_s14 = int_to_ptr.hbm [resolvable:$true] %s15_s14  ;;  %s18_s16 = int_to_ptr.vmem [resolvable:$true] %s17_s16 }
   0x2   :  { %s101_s18 = smov 8  }
   0x3   :  { %23 = dma.hbm_to_vmem [thread:$0]  %s16_s14, 512, %s18_s16, [#allocation3], %s100_s17, %s100_s17, %s101_s18  }
   0x4   :  { %97 = dma.done.wait [#allocation3], 512  }
   0x5   :  { %98 = vsyncadd [#allocation3], 4294966784  ;;  %v35_v0 = vld [vmem:[#allocation2 + $0x10] sm:$0xff]  ;;  %v36_v1 = vld [vmem:[#allocation2 + $0x18] sm:$0xff]  ;;  %vm43_vm0 = vcmask 261120   ;;  %vm61_vm1 = vcmask 257024  }
   0x6   :  { %v33_v2 = vld [vmem:[#allocation2] sm:$0xff]  ;;  %v38_v3 = vpack.c.bf16 %v36_v1, %v35_v0  ;;  %v34_v4 = vld [vmem:[#allocation2 + $0x8] sm:$0xff] }
   0x7   :  { %v37_v5 = vpack.c.bf16 %v34_v4, %v33_v2  ;;  %v31_v6 = vld [vmem:[%s134_s0] sm:$0xff] }
   0x8   :  { %53 = vmatpush.bf16.msra.mxu0 %v38_v3  ;;  %v32_v7 = vpack.c.bf16 %v31_v6, %v31_v6  ;;  %v72_v8 = vld [vmem:[%s136_s2] ss:$0 sm:$0xff] }
   0xc   :  { %54 = vmatpush.bf16.msra.mxu0 %v37_v5 }
   0xf   :  { %68 = vmatmul.msk.bf16.vlgmr.msra.gmra.mxu0 %vm43_vm0, %v32_v7 }
  0x8c   :  { %v56_v9 = vpop.f32.mrf.mxu0 }
  0x8d   :  { %v57_v10 = vadd.f32 %v72_v8, %v56_v9 }
  0x8f   :  { %v60_v11 = vpack.c.bf16 %v57_v10, %v57_v10 }
  0x91   :  { %62 = vst.msk [vmem:[%s137_s3] sm:$0xf] %vm61_vm1, %v60_v11 }
  0x94   :  { %v58_v12 = vpop.f32.mrf.mxu0 }
  0x95   :  { %67 = vsyncpa [#allocation3], 1 }

// kernel: _lambda_.11
= control target key start
LH: loop header
LB: loop body
LE: loop exit
PB: predicated region body
PF: predicated region fallthrough
CT: control target
= control target key end

     0   :  { %8 = vsyncpa [#allocation3], 0  ;;  %s117_s15 = smov [#allocation2]   ;;  %s177_s0 = inlined_call_operand.vmem [shape: f32[32,32], index: 0, kind: input, shape index: {}]   ;;  %s178_s1 = inlined_call_operand.vmem [shape: f32[32,32], index: 1, kind: input, shape index: {}]   ;;  %s179_s2 = inlined_call_operand.hbm [shape: f32[1,32], index: 2, kind: input, shape index: {}]   ;;  %s180_s3 = inlined_call_operand.vmem [shape: bf16[32,32], index: 3, kind: output, shape index: {}]  }
   0x1   :  { %s18_s14 = sshll.u32 %s179_s2, 4  ;;  %s20_s16 = sshll.u32 %s117_s15, 4  ;;  %s19_s14 = int_to_ptr.hbm [resolvable:$true] %s18_s14  ;;  %s21_s16 = int_to_ptr.vmem [resolvable:$true] %s20_s16 }
   0x2   :  { %23 = dma.hbm_to_vmem [thread:$0]  %s19_s14, 16, %s21_s16, [#allocation3]  }
   0x3   :  { %115 = dma.done.wait [#allocation3], 16  }
   0x4   :  { %116 = vsyncadd [#allocation3], 4294967280  ;;  %v37_v0 = vld [vmem:[%s178_s1 + $0x10] sm:$0xff]  ;;  %v38_v1 = vld [vmem:[%s178_s1 + $0x18] sm:$0xff]  ;;  %vm45_vm0 = vcmask 261120   ;;  %vm75_vm1 = vcmask 257024  }
   0x5   :  { %v35_v2 = vld [vmem:[%s178_s1] sm:$0xff]  ;;  %v40_v3 = vpack.c.bf16 %v38_v1, %v37_v0  ;;  %v36_v4 = vld [vmem:[%s178_s1 + $0x8] sm:$0xff]  ;;  %v31_v8 = vld [vmem:[%s177_s0 + $0x10] sm:$0xff] }
   0x6   :  { %v29_v5 = vld [vmem:[%s177_s0] sm:$0xff]  ;;  %v39_v6 = vpack.c.bf16 %v36_v4, %v35_v2  ;;  %v30_v7 = vld [vmem:[%s177_s0 + $0x8] sm:$0xff]  ;;  %v32_v9 = vld [vmem:[%s177_s0 + $0x18] sm:$0xff] }
   0x7   :  { %58 = vmatpush.bf16.msra.mxu0 %v40_v3  ;;  %87 = vmatpush.bf16.msra.mxu1 %v40_v3  ;;  %v33_v10 = vpack.c.bf16 %v30_v7, %v29_v5  ;;  %v34_v11 = vpack.c.bf16 %v32_v9, %v31_v8  ;;  %v90_v12 = vld [vmem:[#allocation2] ss:$0 sm:$0xff] }
   0xb   :  { %59 = vmatpush.bf16.msra.mxu0 %v39_v6  ;;  %88 = vmatpush.bf16.msra.mxu1 %v39_v6 }
   0xe   :  { %85 = vmatmul.msk.bf16.vlgmr.msra.gmra.mxu0 %vm45_vm0, %v33_v10  ;;  %86 = vmatmul.msk.bf16.vlgmr.msra.gmra.mxu1 %vm45_vm0, %v34_v11 }
  0x8b   :  { %v61_v13 = vpop.f32.mrf.mxu0  ;;  %v66_v14 = vpop.f32.mrf.mxu1 }
  0x8c   :  { %v62_v15 = vadd.f32 %v90_v12, %v61_v13  ;;  %v67_v16 = vadd.f32 %v90_v12, %v66_v14 }
  0x8e   :  { %v71_v17 = vpack.c.bf16 %v62_v15, %v62_v15  ;;  %v73_v18 = vpack.c.bf16 %v67_v16, %v67_v16 }
  0x90   :  { %76 = vst.msk [vmem:[%s180_s3] sm:$0xf] %vm75_vm1, %v71_v17 }
  0x91   :  { %78 = vst.msk [vmem:[%s180_s3 + $0x8] sm:$0xf] %vm75_vm1, %v73_v18 }
  0x93   :  { %v63_v19 = vpop.f32.mrf.mxu0  ;;  %v68_v20 = vpop.f32.mrf.mxu1 }
  0x94   :  { %v64_v21 = vadd.f32 %v90_v12, %v63_v19  ;;  %v69_v22 = vadd.f32 %v90_v12, %v68_v20 }
  0x96   :  { %v72_v23 = vpack.c.bf16 %v64_v21, %v64_v21  ;;  %v74_v24 = vpack.c.bf16 %v69_v22, %v69_v22 }
  0x98   :  { %77 = vst.msk [vmem:[%s180_s3 + $0x4] sm:$0xf] %vm75_vm1, %v72_v23 }
  0x99   :  { %79 = vst.msk [vmem:[%s180_s3 + $0xc] sm:$0xf] %vm75_vm1, %v74_v24 }
  0x9a   :  { %84 = vsyncpa [#allocation3], 1 }

// kernel: _lambda_.10
= control target key start
LH: loop header
LB: loop body
LE: loop exit
PB: predicated region body
PF: predicated region fallthrough
CT: control target
= control target key end

     0   :  { %vm31_vm0 = vcmask 261120   ;;  %vm61_vm1 = vcmask 257024   ;;  %s134_s1 = inlined_call_operand.vmem [shape: f32[32,32], index: 1, kind: input, shape index: {}]   ;;  %s135_s0 = inlined_call_operand.vmem [shape: f32[32,32], index: 0, kind: input, shape index: {}]   ;;  %s136_s2 = inlined_call_operand.vmem [shape: f32[1,32], index: 2, kind: input, shape index: {}]   ;;  %s137_s3 = inlined_call_operand.vmem [shape: bf16[32,32], index: 3, kind: output, shape index: {}]  }
   0x1   :  { %v23_v0 = vld [vmem:[%s134_s1 + $0x10] sm:$0xff]  ;;  %v24_v1 = vld [vmem:[%s134_s1 + $0x18] sm:$0xff]  ;;  %v21_v2 = vld [vmem:[%s134_s1] sm:$0xff] }
   0x2   :  { %v26_v3 = vpack.c.bf16 %v24_v1, %v23_v0  ;;  %v22_v4 = vld [vmem:[%s134_s1 + $0x8] sm:$0xff]  ;;  %v15_v5 = vld [vmem:[%s135_s0] sm:$0xff]  ;;  %v17_v8 = vld [vmem:[%s135_s0 + $0x10] sm:$0xff] }
   0x3   :  { %v25_v6 = vpack.c.bf16 %v22_v4, %v21_v2  ;;  %v16_v7 = vld [vmem:[%s135_s0 + $0x8] sm:$0xff]  ;;  %v18_v9 = vld [vmem:[%s135_s0 + $0x18] sm:$0xff]  ;;  %v74_v12 = vld [vmem:[%s136_s2] ss:$0 sm:$0xff] }
   0x4   :  { %44 = vmatpush.bf16.msra.mxu0 %v26_v3  ;;  %72 = vmatpush.bf16.msra.mxu1 %v26_v3  ;;  %v19_v10 = vpack.c.bf16 %v16_v7, %v15_v5  ;;  %v20_v11 = vpack.c.bf16 %v18_v9, %v17_v8 }
   0x8   :  { %45 = vmatpush.bf16.msra.mxu0 %v25_v6  ;;  %73 = vmatpush.bf16.msra.mxu1 %v25_v6 }
   0xb   :  { %70 = vmatmul.msk.bf16.vlgmr.msra.gmra.mxu0 %vm31_vm0, %v19_v10  ;;  %71 = vmatmul.msk.bf16.vlgmr.msra.gmra.mxu1 %vm31_vm0, %v20_v11 }
  0x88   :  { %v47_v13 = vpop.f32.mrf.mxu0  ;;  %v52_v14 = vpop.f32.mrf.mxu1 }
  0x89   :  { %v48_v15 = vadd.f32 %v74_v12, %v47_v13  ;;  %v53_v16 = vadd.f32 %v74_v12, %v52_v14 }
  0x8b   :  { %v57_v17 = vpack.c.bf16 %v48_v15, %v48_v15  ;;  %v59_v18 = vpack.c.bf16 %v53_v16, %v53_v16 }
  0x8d   :  { %62 = vst.msk [vmem:[%s137_s3] sm:$0xf] %vm61_vm1, %v57_v17 }
  0x8e   :  { %64 = vst.msk [vmem:[%s137_s3 + $0x8] sm:$0xf] %vm61_vm1, %v59_v18 }
  0x90   :  { %v49_v19 = vpop.f32.mrf.mxu0  ;;  %v54_v20 = vpop.f32.mrf.mxu1 }
  0x91   :  { %v50_v21 = vadd.f32 %v74_v12, %v49_v19  ;;  %v55_v22 = vadd.f32 %v74_v12, %v54_v20 }
  0x93   :  { %v58_v23 = vpack.c.bf16 %v50_v21, %v50_v21  ;;  %v60_v24 = vpack.c.bf16 %v55_v22, %v55_v22 }
  0x95   :  { %63 = vst.msk [vmem:[%s137_s3 + $0x4] sm:$0xf] %vm61_vm1, %v58_v23 }
  0x96   :  { %65 = vst.msk [vmem:[%s137_s3 + $0xc] sm:$0xf] %vm61_vm1, %v60_v24 }

// kernel: _lambda_.13
= control target key start
LH: loop header
LB: loop body
LE: loop exit
PB: predicated region body
PF: predicated region fallthrough
CT: control target
= control target key end

     0   :  { %vm32_vm0 = vcmask 261120   ;;  %vm52_vm1 = vcmask 257024   ;;  %s110_s1 = inlined_call_operand.vmem [shape: f32[32,32], index: 1, kind: input, shape index: {}]   ;;  %s111_s2 = inlined_call_operand.vmem [shape: f32[1,32], index: 2, kind: input, shape index: {}]   ;;  %s112_s0 = inlined_call_operand.vmem [shape: bf16[16,32], index: 0, kind: input, shape index: {}]   ;;  %s113_s3 = inlined_call_operand.vmem [shape: bf16[16,32], index: 3, kind: output, shape index: {}]  }
   0x1   :  { %v19_v0 = vld [vmem:[%s110_s1 + $0x10] sm:$0xff]  ;;  %v20_v1 = vld [vmem:[%s110_s1 + $0x18] sm:$0xff]  ;;  %v17_v2 = vld [vmem:[%s110_s1] sm:$0xff] }
   0x2   :  { %v22_v3 = vpack.c.bf16 %v20_v1, %v19_v0  ;;  %v18_v4 = vld [vmem:[%s110_s1 + $0x8] sm:$0xff]  ;;  %v64_v6 = vld [vmem:[%s112_s0] sm:$0xff] }
   0x3   :  { %v21_v5 = vpack.c.bf16 %v18_v4, %v17_v2  ;;  %v65_v7 = vld [vmem:[%s111_s2] ss:$0 sm:$0xff] }
   0x4   :  { %42 = vmatpush.bf16.msra.mxu0 %v22_v3 }
   0x8   :  { %43 = vmatpush.bf16.msra.mxu0 %v21_v5 }
   0xb   :  { %63 = vmatmul.msk.bf16.vlgmr.msra.gmra.mxu0 %vm32_vm0, %v64_v6 }
  0x88   :  { %v45_v8 = vpop.f32.mrf.mxu0 }
  0x89   :  { %v46_v9 = vadd.f32 %v65_v7, %v45_v8 }
  0x8b   :  { %v50_v10 = vpack.c.bf16 %v46_v9, %v46_v9 }
  0x8d   :  { %53 = vst.msk [vmem:[%s113_s3] sm:$0xf] %vm52_vm1, %v50_v10 }
  0x90   :  { %v47_v11 = vpop.f32.mrf.mxu0 }
  0x91   :  { %v48_v12 = vadd.f32 %v65_v7, %v47_v11 }
  0x93   :  { %v51_v13 = vpack.c.bf16 %v48_v12, %v48_v12 }
  0x95   :  { %54 = vst.msk [vmem:[%s113_s3 + $0x4] sm:$0xf] %vm52_vm1, %v51_v13 }

// kernel: _lambda_.12
= control target key start
LH: loop header
LB: loop body
LE: loop exit
PB: predicated region body
PF: predicated region fallthrough
CT: control target
= control target key end

     0   :  { %s849_s15 = smov 0   ;;  %s851_s16 = smov 0   ;;  %s939_s0 = inlined_call_operand.vmem [shape: bf16[2,4,4,8], index: 0, kind: input, shape index: {}]   ;;  %s940_s1 = inlined_call_operand.vmem [shape: bf16[4,4,8,8], index: 1, kind: input, shape index: {}]   ;;  %s941_s2 = inlined_call_operand.vmem [shape: bf16[4,4,8,8], index: 2, kind: input, shape index: {}]   ;;  %s942_s3 = inlined_call_operand.vmem [shape: f32[4,1,8], index: 3, kind: input, shape index: {}]   ;;  %s943_s4 = inlined_call_operand.vmem [shape: bf16[4,4,32], index: 4, kind: output, shape index: {}]  }
   0x1   :  { %s853_s17 = smov 0   ;;  %s855_s18 = smov 0  }
   0x2   :  { %s857_s19 = smov 0  }
   0x3 LB: > { %s23_s20 = sadd.s32 1, %s810_s17  ;;  %s26_s21 = sadd.s32 1, %s814_s18  ;;  %s818_s19 = sphi %s857_s19, %s14_s19   ;;  %s814_s18 = sphi %s855_s18, %s947_s18   ;;  %s810_s17 = sphi %s853_s17, %s946_s17   ;;  %s806_s16 = sphi %s851_s16, %s945_s16   ;;  %s802_s15 = sphi %s849_s15, %s944_s15  }
   0x4   : > { %p24_p0 = scmp.ge.s32.totalorder %s23_s20, 2  ;;  %p695_p1 = scmp.ge.s32.totalorder %s818_s19, 1 }
   0x5   : > { %p230_p2 = scmp.lt.s32.totalorder %s818_s19, 5 }
   0x6   : > { %s949_s20 = smov (%p24_p0, %s23_s20), 0  ;;  %s951_s21 = smov (!%p24_p0, %s26_s21), %s814_s18 }
   0x7   : > { %p231_p3 = pnand %p695_p1, %p230_p2  ;;  %p28_p4 = scmp.ge.s32.totalorder %s951_s21, 2 }
   0x8   : > { %s698_s22 = sshll.u32 (!%p231_p3), %s802_s15, 1  ;;  %p276_p5 = scmp.lt.s32.totalorder (!%p231_p3), %s806_s16, 1 }
   0x9   : > { %s953_s21 = smov (%p28_p4, %s951_s21), 0  ;;  %234 = sbr.rel (%p231_p3) target bundleno = 556 (0x22c), region = 36 }
   0xa   : > { %s282_s23 = sadd.s32 (!%p231_p3), %s806_s16, %s698_s22  ;;  %s821_s12 = smov (!%p231_p3), 8  }
   0xb   : > { %p283_p6 = scmp.lt.s32.totalorder (!%p231_p3), %s282_s23, 3  ;;  %s822_s13 = smov (!%p231_p3), 16  }
   0xc   : > { %s823_s14 = smov (!%p231_p3), 24  }
   0xe   : > { %s955_s16 = smov (!%p276_p5, %s806_s16), 1  ;;  %s957_s23 = smov (!%p283_p6, %s282_s23), 3  ;;  %vm345_vm0 = vcmask 64512   ;;  %v820_v25 = vmov 0.0   ;;  %vm422_vm2 = vcmask 60416   ;;  %vm466_vm3 = vcmask 1043456  }
   0xf   : > { %s717_s24 = sshll.u32 %s955_s16, 3  ;;  %s718_s25 = sshll.u32 %s957_s23, 4  ;;  %vm570_vm4 = vcmask 130048   ;;  %vm573_vm5 = vcmask 195584   ;;  %vm577_vm6 = vcmask 254976  }
  0x10   : > { %s280_s28 = scalar_lea.vmem %s939_s0, %s717_s24  ;;  %s287_s5 = scalar_lea.vmem %s940_s1, %s718_s25 }
  0x11   : > { %v316_v0 = vld [vmem:[%s280_s28 + $0x2] sm:$0x3]  ;;  %v317_v1 = vld [vmem:[%s280_s28 + $0x4] sm:$0x3]  ;;  %v318_v2 = vld [vmem:[%s280_s28 + $0x6] sm:$0x3]  ;;  %s303_s8 = scalar_lea.vmem %s942_s3, %s957_s23  ;;  %s296_s11 = scalar_lea.vmem %s941_s2, %s718_s25 }
  0x12   : > { %v332_v3 = vld [vmem:[%s287_s5 + $0x4] sm:$0xf]  ;;  %v333_v4 = vld [vmem:[%s287_s5 + $0x8] sm:$0xf]  ;;  %v334_v5 = vld [vmem:[%s287_s5 + $0xc] sm:$0xf]  ;;  %v320_v6 = vunpack.c.l.bf16 %v316_v0  ;;  %v321_v7 = vunpack.c.l.bf16 %v317_v1  ;;  %v322_v8 = vunpack.c.l.bf16 %v318_v2 }
  0x13   : > { %v369_v9 = vsel %vm345_vm0, %v332_v3, 0  ;;  %v388_v10 = vsel %vm345_vm0, %v333_v4, 0  ;;  %v407_v11 = vsel %vm345_vm0, %v334_v5, 0  ;;  %v331_v12 = vld [vmem:[%s287_s5] sm:$0xf]  ;;  %s706_s15 = sshll.u32 %s957_s23, 1 }
  0x14   : > { %378 = vmatpush.bf16.xpose.msra.mxu1 %v369_v9  ;;  %397 = vmatpush.bf16.xpose.msra.mxu2 %v388_v10  ;;  %v324_v13 = vmul.f32 0.35351563, %v320_v6  ;;  %v325_v14 = vmul.f32 0.35351563, %v321_v7  ;;  %v326_v15 = vmul.f32 0.35351563, %v322_v8  ;;  %v350_v16 = vsel %vm345_vm0, %v331_v12, 0  ;;  %v315_v17 = vld [vmem:[%s280_s28] sm:$0x3]  ;;  %s311_s24 = scalar_lea.vmem %s943_s4, %s706_s15 }
  0x15   : > { %416 = vmatpush.bf16.xpose.msra.mxu3 %v407_v11  ;;  %359 = vmatpush.bf16.xpose.msra.mxu0 %v350_v16  ;;  %v319_v18 = vunpack.c.l.bf16 %v315_v17  ;;  %v339_v24 = vld [vmem:[%s303_s8] sm:$0x1]  ;;  %v336_v44 = vld [vmem:[%s296_s11 + $0x4] sm:$0xf]  ;;  %v337_v46 = vld [vmem:[%s296_s11 + $0x8] sm:$0xf] }
  0x16   : > { %v328_v19 = vpack.c.bf16 %v324_v13, %v324_v13  ;;  %v329_v20 = vpack.c.bf16 %v325_v14, %v325_v14  ;;  %v330_v22 = vpack.c.bf16 %v326_v15, %v326_v15  ;;  %vm340_vm1 = vcmp.gt.f32.partialorder %v339_v24, 0.5  ;;  %v338_v47 = vld [vmem:[%s296_s11 + $0xc] sm:$0xf]  ;;  %v335_v50 = vld [vmem:[%s296_s11] sm:$0xf] }
  0x17   : > { %v323_v21 = vmul.f32 0.35351563, %v319_v18  ;;  %v341_v26 = vsel %vm340_vm1, -1e+30, %v820_v25  ;;  %v487_v45 = vsel %vm466_vm3, %v336_v44, 0  ;;  %v506_v48 = vsel %vm466_vm3, %v337_v46, 0 }
  0x18   : > { %v343_v27 = vperm.slane %v341_v26, 0  ;;  %v525_v49 = vsel %vm466_vm3, %v338_v47, 0  ;;  %v468_v51 = vsel %vm466_vm3, %v335_v50, 0 }
  0x19   : > { %v327_v23 = vpack.c.bf16 %v323_v21, %v323_v21 }
  0x1b   : > { %708 = vmatmul.msk.bf16.vlgmr.msra.gmra.mxu1 %vm345_vm0, %v328_v19  ;;  %709 = vmatmul.msk.bf16.vlgmr.msra.gmra.mxu2 %vm345_vm0, %v329_v20 }
  0x1c   : > { %710 = vmatmul.msk.bf16.vlgmr.msra.gmra.mxu3 %vm345_vm0, %v330_v22  ;;  %707 = vmatmul.msk.bf16.vlgmr.msra.gmra.mxu0 %vm345_vm0, %v327_v23 }
  0x1d   : > { %496 = vmatpush.bf16.msrb.mxu1 %v487_v45  ;;  %515 = vmatpush.bf16.msrb.mxu2 %v506_v48 }
  0x1e   : > { %534 = vmatpush.bf16.msrb.mxu3 %v525_v49  ;;  %477 = vmatpush.bf16.msrb.mxu0 %v468_v51 }
  0x98   : > { %v380_v28 = vpop.f32.mrf.mxu1 }
  0x99   : > { %v381_v29 = vadd.f32 %v380_v28, %v343_v27  ;;  %v361_v30 = vpop.f32.mrf.mxu0 }
  0x9a   : > { %v362_v32 = vadd.f32 %v361_v30, %v343_v27 }
  0x9b   : > { %v426_v31 = vsel %vm422_vm2, %v381_v29, -inf }
  0x9c   : > { %427 = vmax.xlane.f32.xlu1 %v426_v31  ;;  %v423_v38 = vsel %vm422_vm2, %v362_v32, -inf }
  0x9e   : > { %v399_v33 = vpop.f32.mrf.mxu2 }
  0x9f   : > { %v400_v34 = vadd.f32 %v399_v33, %v343_v27  ;;  %v418_v35 = vpop.f32.mrf.mxu3 }
  0xa0   : > { %v382_v36 = vpop.f32.mrf.mxu1  ;;  %v419_v40 = vadd.f32 %v418_v35, %v343_v27 }
  0xa1   : > { %v429_v37 = vsel %vm422_vm2, %v400_v34, -inf  ;;  %v363_v39 = vpop.f32.mrf.mxu0 }
  0xa2   : > { %430 = vmax.xlane.f32.xlu0 %v429_v37  ;;  %v432_v43 = vsel %vm422_vm2, %v419_v40, -inf }
  0xa4   : > { %424 = vmax.xlane.f32.xlu1 %v423_v38 }
  0xa6   : > { %v401_v41 = vpop.f32.mrf.mxu2 }
  0xa7   : > { %v420_v42 = vpop.f32.mrf.mxu3 }
  0xaa   : > { %433 = vmax.xlane.f32.xlu0 %v432_v43 }
 0x10f   : > { %v428_v52 = vpop.xlane.xlu1 %427 }
 0x110   : > { %v436_v53 = vsub.f32 %v381_v29, %v428_v52 }
 0x112   : > { %v441_v54 = vmul.f32 1.442695, %v436_v53 }
 0x114   : > { %764 = vpow2.f32 %v441_v54 }
 0x115   : > { %v431_v55 = vpop.xlane.xlu0 %430 }
 0x116   : > { %v437_v56 = vsub.f32 %v400_v34, %v431_v55 }
 0x117   : > { %v425_v57 = vpop.xlane.xlu1 %424 }
 0x118   : > { %v443_v58 = vmul.f32 1.442695, %v437_v56  ;;  %v435_v59 = vsub.f32 %v362_v32, %v425_v57 }
 0x11a   : > { %v765_v60 = vpop.eup %764  ;;  %766 = vpow2.f32 %v443_v58  ;;  %v439_v61 = vmul.f32 1.442695, %v435_v59 }
 0x11b   : > { %v450_v62 = vsel %vm422_vm2, %v765_v60, 0.0  ;;  %v460_v63 = vpack.c.bf16 %v765_v60, %v765_v60 }
 0x11c   : > { %768 = vpow2.f32 %v439_v61  ;;  %451 = vadd.xlane.f32.xlu2 %v450_v62 }
 0x11d   : > { %v434_v0 = vpop.xlane.xlu0 %433  ;;  %712 = vmatmul.msk.bf16.vlgmr.msrb.gmra.mxu1 %vm345_vm0, %v460_v63 }
 0x11e   : > { %v438_v1 = vsub.f32 %v419_v40, %v434_v0 }
 0x120   : > { %v767_v2 = vpop.eup %766  ;;  %v445_v3 = vmul.f32 1.442695, %v438_v1 }
 0x121   : > { %v461_v4 = vpack.c.bf16 %v767_v2, %v767_v2  ;;  %v453_v6 = vsel %vm422_vm2, %v767_v2, 0.0 }
 0x122   : > { %v769_v5 = vpop.eup %768  ;;  %770 = vpow2.f32 %v445_v3 }
 0x123   : > { %713 = vmatmul.msk.bf16.vlgmr.msrb.gmra.mxu2 %vm345_vm0, %v461_v4  ;;  %v459_v7 = vpack.c.bf16 %v769_v5, %v769_v5  ;;  %v447_v8 = vsel %vm422_vm2, %v769_v5, 0.0 }
 0x124   : > { %454 = vadd.xlane.f32.xlu2 %v453_v6  ;;  %448 = vadd.xlane.f32.xlu1 %v447_v8 }
 0x125   : > { %711 = vmatmul.msk.bf16.vlgmr.msrb.gmra.mxu0 %vm345_vm0, %v459_v7 }
 0x128   : > { %v771_v9 = vpop.eup %770 }
 0x129   : > { %v456_v10 = vsel %vm422_vm2, %v771_v9, 0.0  ;;  %v462_v11 = vpack.c.bf16 %v771_v9, %v771_v9 }
 0x12a   : > { %457 = vadd.xlane.f32.xlu0 %v456_v10 }
 0x12b   : > { %714 = vmatmul.msk.bf16.vlgmr.msrb.gmra.mxu3 %vm345_vm0, %v462_v11 }
 0x18f   : > { %v452_v12 = vpop.xlane.xlu2 %451 }
 0x190   : > { %772 = vrcp.f32 %v452_v12 }
 0x196   : > { %v773_v13 = vpop.eup %772 }
 0x197   : > { %v455_v16 = vpop.xlane.xlu2 %454  ;;  %v449_v38 = vpop.xlane.xlu1 %448 }
 0x198   : > { %774 = vrcp.f32 %v455_v16 }
 0x19a   : > { %v498_v14 = vpop.f32.mrf.mxu1 }
 0x19b   : > { %v545_v15 = vmul.f32 %v773_v13, %v498_v14 }
 0x19d   : > { %v549_v17 = vpack.c.bf16 %v545_v15, %v545_v15  ;;  %v458_v22 = vpop.xlane.xlu0 %457 }
 0x19e   : > { %v775_v23 = vpop.eup %774  ;;  %776 = vrcp.f32 %v458_v22 }
 0x19f   : > { %v553_v18 = vunpack.c.l.b16 %v549_v17  ;;  %778 = vrcp.f32 %v449_v38 }
 0x1a1   : > { %v554_v19 = vpack.c.b16 %v553_v18, %v553_v18 }
 0x1a2   : > { %v479_v20 = vpop.f32.mrf.mxu0  ;;  %v500_v21 = vpop.f32.mrf.mxu1 }
 0x1a3   : > { %555 = vrot.lane.b32.xlu2 %v554_v19, %s821_s12 }
 0x1a4   : > { %v777_v30 = vpop.eup %776 }
 0x1a5   : > { %v779_v39 = vpop.eup %778 }
 0x1a6   : > { %v517_v24 = vpop.f32.mrf.mxu2  ;;  %v544_v40 = vmul.f32 %v779_v39, %v479_v20 }
 0x1a7   : > { %v546_v25 = vmul.f32 %v775_v23, %v517_v24 }
 0x1a8   : > { %v548_v42 = vpack.c.bf16 %v544_v40, %v544_v40 }
 0x1a9   : > { %v550_v26 = vpack.c.bf16 %v546_v25, %v546_v25 }
 0x1aa   : > { %v481_v27 = vpop.f32.mrf.mxu0 }
 0x1ab   : > { %v558_v28 = vunpack.c.l.b16 %v550_v26 }
 0x1ad   : > { %v559_v29 = vpack.c.b16 %v558_v28, %v558_v28 }
 0x1ae   : > { %v519_v31 = vpop.f32.mrf.mxu2  ;;  %v536_v32 = vpop.f32.mrf.mxu3 }
 0x1af   : > { %v547_v33 = vmul.f32 %v777_v30, %v536_v32  ;;  %560 = vrot.lane.b32.xlu0 %v559_v29, %s822_s13 }
 0x1b1   : > { %v551_v34 = vpack.c.bf16 %v547_v33, %v547_v33 }
 0x1b3   : > { %v563_v35 = vunpack.c.l.b16 %v551_v34 }
 0x1b5   : > { %v564_v36 = vpack.c.b16 %v563_v35, %v563_v35 }
 0x1b6   : > { %v538_v37 = vpop.f32.mrf.mxu3 }
 0x1b7   : > { %565 = vrot.lane.b32.xlu1 %v564_v36, %s823_s14 }
 0x1fd   : > { %v556_v41 = vpop.permute.xlu2 %555 }
 0x1fe   : > { %v569_v44 = vsel %vm345_vm0, %v548_v42, %v556_v41 }
 0x221   : > { %v561_v43 = vpop.permute.xlu0 %560 }
 0x222   : > { %v572_v45 = vsel %vm570_vm4, %v569_v44, %v561_v43 }
 0x229   : > { %v566_v46 = vpop.permute.xlu1 %565 }
 0x22a   : > { %v575_v47 = vsel %vm573_vm5, %v572_v45, %v566_v46 }
 0x22b   : > { %578 = vst.msk [vmem:[%s311_s24] sm:$0x3] %vm577_vm6, %v575_v47 }
 0x22c PF: > { %s14_s19 = sadd.s32 1, %s818_s19   ;;  %s944_s15 = smov %s810_s17 }
 0x22d   : > { %p11_p7 = scmp.ge.s32.totalorder %s14_s19, 6   ;;  %s945_s16 = smov %s814_s18 }
 0x22e   : > { %s946_s17 = smov %s949_s20  ;;  %s947_s18 = smov %s953_s21 }
 0x22f   :  { %13 = sbr.rel (!%p11_p7) target bundleno = 3 (0x3), region = 75 }

// kernel: _lambda_.15
= control target key start
LH: loop header
LB: loop body
LE: loop exit
PB: predicated region body
PF: predicated region fallthrough
CT: control target
= control target key end

     0   :  { %vm32_vm0 = vcmask 261120   ;;  %vm52_vm1 = vcmask 519168   ;;  %s110_s1 = inlined_call_operand.vmem [shape: f32[32,64], index: 1, kind: input, shape index: {}]   ;;  %s111_s2 = inlined_call_operand.vmem [shape: f32[1,64], index: 2, kind: input, shape index: {}]   ;;  %s112_s0 = inlined_call_operand.vmem [shape: bf16[16,32], index: 0, kind: input, shape index: {}]   ;;  %s113_s3 = inlined_call_operand.vmem [shape: bf16[16,64], index: 3, kind: output, shape index: {}]  }
   0x1   :  { %v19_v0 = vld [vmem:[%s110_s1 + $0x10] sm:$0xff]  ;;  %v20_v1 = vld [vmem:[%s110_s1 + $0x18] sm:$0xff]  ;;  %v17_v2 = vld [vmem:[%s110_s1] sm:$0xff] }
   0x2   :  { %v22_v3 = vpack.c.bf16 %v20_v1, %v19_v0  ;;  %v18_v4 = vld [vmem:[%s110_s1 + $0x8] sm:$0xff]  ;;  %v64_v6 = vld [vmem:[%s112_s0] sm:$0xff] }
   0x3   :  { %v21_v5 = vpack.c.bf16 %v18_v4, %v17_v2  ;;  %v65_v7 = vld [vmem:[%s111_s2] ss:$0 sm:$0xff] }
   0x4   :  { %42 = vmatpush.bf16.msra.mxu0 %v22_v3 }
   0x8   :  { %43 = vmatpush.bf16.msra.mxu0 %v21_v5 }
   0xb   :  { %63 = vmatmul.msk.bf16.vlgmr.msra.gmra.mxu0 %vm32_vm0, %v64_v6 }
  0x88   :  { %v45_v8 = vpop.f32.mrf.mxu0 }
  0x89   :  { %v46_v9 = vadd.f32 %v65_v7, %v45_v8 }
  0x8b   :  { %v50_v10 = vpack.c.bf16 %v46_v9, %v46_v9 }
  0x8d   :  { %53 = vst.msk [vmem:[%s113_s3] sm:$0xf] %vm52_vm1, %v50_v10 }
  0x90   :  { %v47_v11 = vpop.f32.mrf.mxu0 }
  0x91   :  { %v48_v12 = vadd.f32 %v65_v7, %v47_v11 }
  0x93   :  { %v51_v13 = vpack.c.bf16 %v48_v12, %v48_v12 }
  0x95   :  { %54 = vst.msk [vmem:[%s113_s3 + $0x4] sm:$0xf] %vm52_vm1, %v51_v13 }

// kernel: _lambda_.14
= control target key start
LH: loop header
LB: loop body
LE: loop exit
PB: predicated region body
PF: predicated region fallthrough
CT: control target
= control target key end

     0   :  { %vm27_vm0 = vcmask 261120   ;;  %vm45_vm1 = vcmask 257024   ;;  %s94_s1 = inlined_call_operand.vmem [shape: f32[32,32], index: 1, kind: input, shape index: {}]   ;;  %s95_s0 = inlined_call_operand.vmem [shape: f32[8,32], index: 0, kind: input, shape index: {}]   ;;  %s96_s2 = inlined_call_operand.vmem [shape: f32[1,32], index: 2, kind: input, shape index: {}]   ;;  %s97_s3 = inlined_call_operand.vmem [shape: bf16[8,32], index: 3, kind: output, shape index: {}]  }
   0x1   :  { %v19_v0 = vld [vmem:[%s94_s1 + $0x10] sm:$0xff]  ;;  %v20_v1 = vld [vmem:[%s94_s1 + $0x18] sm:$0xff]  ;;  %v17_v2 = vld [vmem:[%s94_s1] sm:$0xff] }
   0x2   :  { %v22_v3 = vpack.c.bf16 %v20_v1, %v19_v0  ;;  %v18_v4 = vld [vmem:[%s94_s1 + $0x8] sm:$0xff]  ;;  %v15_v6 = vld [vmem:[%s95_s0] sm:$0xff] }
   0x3   :  { %v21_v5 = vpack.c.bf16 %v18_v4, %v17_v2  ;;  %v16_v7 = vpack.c.bf16 %v15_v6, %v15_v6  ;;  %v52_v8 = vld [vmem:[%s96_s2] ss:$0 sm:$0xff] }
   0x4   :  { %37 = vmatpush.bf16.msra.mxu0 %v22_v3 }
   0x8   :  { %38 = vmatpush.bf16.msra.mxu0 %v21_v5 }
   0xb   :  { %51 = vmatmul.msk.bf16.vlgmr.msra.gmra.mxu0 %vm27_vm0, %v16_v7 }
  0x88   :  { %v40_v9 = vpop.f32.mrf.mxu0 }
  0x89   :  { %v41_v10 = vadd.f32 %v52_v8, %v40_v9 }
  0x8b   :  { %v44_v11 = vpack.c.bf16 %v41_v10, %v41_v10 }
  0x8d   :  { %46 = vst.msk [vmem:[%s97_s3] sm:$0xf] %vm45_vm1, %v44_v11 }
  0x90   :  { %v42_v12 = vpop.f32.mrf.mxu0 }

// kernel: _lambda_.17
= control target key start
LH: loop header
LB: loop body
LE: loop exit
PB: predicated region body
PF: predicated region fallthrough
CT: control target
= control target key end

     0   :  { %s132_s0 = inlined_call_operand.vmem [shape: bf16[8,32], index: 0, kind: input, shape index: {}]   ;;  %s133_s1 = inlined_call_operand.vmem [shape: f32[32,32], index: 1, kind: input, shape index: {}]   ;;  %s134_s2 = inlined_call_operand.vmem [shape: f32[1,32], index: 2, kind: input, shape index: {}]   ;;  %s135_s3 = inlined_call_operand.hbm [shape: f32[8,32], index: 3, kind: output, shape index: {}]  }
   0x1   :  { %v19_v0 = vld [vmem:[%s133_s1 + $0x10] sm:$0xff]  ;;  %v20_v1 = vld [vmem:[%s133_s1 + $0x18] sm:$0xff]  ;;  %v17_v2 = vld [vmem:[%s133_s1] sm:$0xff] }
   0x2   :  { %v22_v3 = vpack.c.bf16 %v20_v1, %v19_v0  ;;  %v18_v4 = vld [vmem:[%s133_s1 + $0x8] sm:$0xff] }
   0x3   :  { %8 = vsyncpa [#allocation3], 0  ;;  %v21_v5 = vpack.c.bf16 %v18_v4, %v17_v2  ;;  %v16_v6 = vld [vmem:[%s132_s0] sm:$0xf]  ;;  %vm27_vm0 = vcmask 261120   ;;  %s90_s24 = smov [#allocation2]  }
   0x4   :  { %37 = vmatpush.bf16.msra.mxu0 %v22_v3  ;;  %v63_v7 = vld [vmem:[%s134_s2] ss:$0 sm:$0xff]  ;;  %s50_s25 = sshll.u32 %s90_s24, 4  ;;  %s52_s1 = sshll.u32 %s135_s3, 4  ;;  %s51_s25 = int_to_ptr.vmem [resolvable:$true] %s50_s25  ;;  %s53_s1 = int_to_ptr.hbm [resolvable:$true] %s52_s1 }
   0x8   :  { %38 = vmatpush.bf16.msra.mxu0 %v21_v5 }
   0xb   :  { %61 = vmatmul.msk.bf16.vlgmr.msra.gmra.mxu0 %vm27_vm0, %v16_v6 }
  0x88   :  { %v40_v8 = vpop.f32.mrf.mxu0 }
  0x89   :  { %v41_v9 = vadd.f32 %v63_v7, %v40_v8 }
  0x8b   :  { %44 = vst.msk [vmem:[#allocation2] sm:$0xff] %vm27_vm0, %v41_v9 }
  0x8c   :  { %55 = dma.vmem_to_hbm [thread:$0]  %s51_s25, 128, %s53_s1, [#allocation3]  }
  0x90   :  { %v42_v10 = vpop.f32.mrf.mxu0 }
  0x91   :  { %88 = dma.done.wait [#allocation3], 128  }
  0x92   :  { %89 = vsyncadd [#allocation3], 4294967168 }
  0x93   :  { %60 = vsyncpa [#allocation3], 1 }

// kernel: _lambda_.16
= control target key start
LH: loop header
LB: loop body
LE: loop exit
PB: predicated region body
PF: predicated region fallthrough
CT: control target
= control target key end

     0   :  { %s1005_s18 = smov 0   ;;  %s1007_s19 = smov 0   ;;  %s1151_s0 = inlined_call_operand.vmem [shape: bf16[8,4,1,8], index: 0, kind: input, shape index: {}]   ;;  %s1152_s1 = inlined_call_operand.vmem [shape: bf16[8,4,2,8], index: 1, kind: input, shape index: {}]   ;;  %s1153_s2 = inlined_call_operand.vmem [shape: bf16[8,4,2,8], index: 2, kind: input, shape index: {}]   ;;  %s1154_s3 = inlined_call_operand.vmem [shape: f32[8,1,2], index: 3, kind: input, shape index: {}]   ;;  %s1155_s4 = inlined_call_operand.vmem [shape: bf16[8,1,32], index: 4, kind: output, shape index: {0}]   ;;  %s1156_s5 = inlined_call_operand.vmem [shape: f32[8,1,2], index: 5, kind: output, shape index: {1}]  }
   0x1   :  { %s1009_s20 = smov 0  }
   0x2 LB: > { %s28_s21 = sadd.s32 1, %s961_s19  ;;  %p866_p0 = scmp.ge.s32.totalorder %s965_s20, 1  ;;  %s965_s20 = sphi %s1009_s20, %s16_s20   ;;  %s961_s19 = sphi %s1007_s19, %s1158_s19   ;;  %s957_s18 = sphi %s1005_s18, %s1157_s18  }
   0x3   : > { %p30_p1 = scmp.ge.s32.totalorder %s28_s21, 2  ;;  %p267_p2 = scmp.lt.s32.totalorder %s965_s20, 3 }
   0x5   : > { %s1160_s21 = smov (%p30_p1, %s28_s21), 0  ;;  %p268_p3 = pnand %p866_p0, %p267_p2 }
   0x6   : > { %s867_s22 = sshll.u32 (!%p268_p3), %s957_s18, 2  ;;  %s1052_s17 = smov (!%p268_p3), 0  }
   0x7   : > { %271 = sbr.rel (%p268_p3) target bundleno = 692 (0x2b4), region = 36  ;;  %p323_p4 = scmp.lt.s32.totalorder (!%p268_p3), %s867_s22, 7 }
   0xc   : > { %s1162_s22 = smov (!%p323_p4, %s867_s22), 7 }
   0xd   : > { %s1026_s23 = sshll.u32 %s1162_s22, 2  ;;  %s353_s26 = scalar_lea.vmem %s1154_s3, %s1162_s22 }
   0xe   : > { %s326_s29 = scalar_lea.vmem %s1151_s0, %s1026_s23  ;;  %s334_s7 = scalar_lea.vmem %s1152_s1, %s1026_s23 }
   0xf   : > { %s344_s10 = scalar_lea.vmem %s1153_s2, %s1026_s23  ;;  %s362_s13 = scalar_lea.vmem %s1155_s4, %s1162_s22 }
  0x10   : > { %s371_s16 = scalar_lea.vmem %s1156_s5, %s1162_s22 }
  0x11 LB: >> { %s1058_s18 = sshll.u32 %s969_s17, 2  ;;  %vm414_vm0 = vcmask 64512   ;;  %s410_s11 = scalar_lea.vmem %s353_s26, %s969_s17  ;;  %v971_v25 = vmov 0.0   ;;  %vm491_vm2 = vcmask 8192   ;;  %vm596_vm3 = vcmask 1040384   ;;  %s969_s17 = sphi %s1052_s17, %s381_s17  }
  0x12   : >> { %s400_s27 = scalar_lea.vmem %s334_s7, %s1058_s18  ;;  %s383_s6 = scalar_lea.vmem %s326_s29, %s1058_s18  ;;  %v411_v24 = vld [vmem:[%s410_s11] sm:$0x1]  ;;  %vm592_vm11 = vcmask 15360  }
  0x13   : >> { %v402_v0 = vld [vmem:[%s400_s27 + $0x1] sm:$0x1]  ;;  %v403_v1 = vld [vmem:[%s400_s27 + $0x2] sm:$0x1]  ;;  %v404_v2 = vld [vmem:[%s400_s27 + $0x3] sm:$0x1]  ;;  %s405_s15 = scalar_lea.vmem %s344_s10, %s1058_s18  ;;  %s678_s25 = scalar_lea.vmem %s371_s16, %s969_s17 }
  0x14   : >> { %v438_v3 = vsel %vm414_vm0, %v402_v0, 0  ;;  %v457_v4 = vsel %vm414_vm0, %v403_v1, 0  ;;  %v476_v5 = vsel %vm414_vm0, %v404_v2, 0  ;;  %v385_v6 = vld [vmem:[%s383_s6 + $0x1] sm:$0x1]  ;;  %vm412_vm1 = vcmp.gt.f32.partialorder %v411_v24, 0.5  ;;  %s709_s9 = scalar_lea.vmem %s362_s13, %s969_s17 }
  0x15   : >> { %447 = vmatpush.bf16.xpose.msra.mxu1 %v438_v3  ;;  %466 = vmatpush.bf16.xpose.msra.mxu2 %v457_v4  ;;  %v389_v7 = vunpack.c.l.bf16 %v385_v6  ;;  %v386_v8 = vld [vmem:[%s383_s6 + $0x2] sm:$0x1]  ;;  %v387_v9 = vld [vmem:[%s383_s6 + $0x3] sm:$0x1]  ;;  %v401_v10 = vld [vmem:[%s400_s27] sm:$0x1] }
  0x16   : >> { %485 = vmatpush.bf16.xpose.msra.mxu3 %v476_v5  ;;  %v390_v11 = vunpack.c.l.bf16 %v386_v8  ;;  %v391_v12 = vunpack.c.l.bf16 %v387_v9  ;;  %v419_v13 = vsel %vm414_vm0, %v401_v10, 0  ;;  %v384_v14 = vld [vmem:[%s383_s6] sm:$0x1]  ;;  %v413_v26 = vsel %vm412_vm1, -1e+30, %v971_v25  ;;  %s972_s27 = smov 8  }
  0x17   : >> { %v393_v15 = vmul.f32 0.35351563, %v389_v7  ;;  %428 = vmatpush.bf16.xpose.msra.mxu0 %v419_v13  ;;  %v388_v16 = vunpack.c.l.bf16 %v384_v14  ;;  %v407_v63 = vld [vmem:[%s405_s15 + $0x1] sm:$0x1]  ;;  %v408_v1 = vld [vmem:[%s405_s15 + $0x2] sm:$0x1]  ;;  %s973_s28 = smov 16  }
  0x18   : >> { %v394_v17 = vmul.f32 0.35351563, %v390_v11  ;;  %v395_v18 = vmul.f32 0.35351563, %v391_v12  ;;  %v617_v0 = vsel %vm596_vm3, %v407_v63, 0  ;;  %v636_v2 = vsel %vm596_vm3, %v408_v1, 0  ;;  %v406_v3 = vld [vmem:[%s405_s15] sm:$0x1] }
  0x19   : >> { %v397_v19 = vpack.c.bf16 %v393_v15, %v393_v15  ;;  %v392_v20 = vmul.f32 0.35351563, %v388_v16  ;;  %v598_v4 = vsel %vm596_vm3, %v406_v3, 0  ;;  %v409_v5 = vld [vmem:[%s405_s15 + $0x3] sm:$0x1]  ;;  %s974_s30 = smov 24   ;;  %s381_s17 = sadd.s32 1, %s969_s17  }
  0x1a   : >> { %v398_v21 = vpack.c.bf16 %v394_v17, %v394_v17  ;;  %v399_v22 = vpack.c.bf16 %v395_v18, %v395_v18  ;;  %v655_v6 = vsel %vm596_vm3, %v409_v5, 0  ;;  %p378_p5 = scmp.ge.s32.totalorder %s381_s17, 4  }
  0x1b   : >> { %v396_v23 = vpack.c.bf16 %v392_v20, %v392_v20 }
  0x1c   : >> { %878 = vmatmul.msk.bf16.vlgmr.msra.gmra.mxu1 %vm414_vm0, %v397_v19  ;;  %879 = vmatmul.msk.bf16.vlgmr.msra.gmra.mxu2 %vm414_vm0, %v398_v21 }
  0x1d   : >> { %880 = vmatmul.msk.bf16.vlgmr.msra.gmra.mxu3 %vm414_vm0, %v399_v22  ;;  %626 = vmatpush.bf16.msrb.mxu1 %v617_v0 }
  0x1e   : >> { %877 = vmatmul.msk.bf16.vlgmr.msra.gmra.mxu0 %vm414_vm0, %v396_v23  ;;  %645 = vmatpush.bf16.msrb.mxu2 %v636_v2 }
  0x1f   : >> { %607 = vmatpush.bf16.msrb.mxu0 %v598_v4  ;;  %664 = vmatpush.bf16.msrb.mxu3 %v655_v6 }
  0x99   : >> { %v449_v27 = vpop.f32.mrf.mxu1 }
  0x9a   : >> { %v450_v28 = vadd.f32 %v449_v27, %v413_v26 }
  0x9b   : >> { %v430_v29 = vpop.f32.mrf.mxu0 }
  0x9c   : >> { %v495_v30 = vsel %vm491_vm2, %v450_v28, -inf  ;;  %v431_v31 = vadd.f32 %v430_v29, %v413_v26 }
  0x9d   : >> { %496 = vmax.xlane.f32.xlu1 %v495_v30 }
  0x9e   : >> { %v492_v37 = vsel %vm491_vm2, %v431_v31, -inf }
  0x9f   : >> { %v468_v32 = vpop.f32.mrf.mxu2 }
  0xa0   : >> { %v469_v33 = vadd.f32 %v468_v32, %v413_v26  ;;  %v487_v34 = vpop.f32.mrf.mxu3 }
  0xa1   : >> { %v451_v35 = vpop.f32.mrf.mxu1  ;;  %v488_v39 = vadd.f32 %v487_v34, %v413_v26 }
  0xa2   : >> { %v498_v36 = vsel %vm491_vm2, %v469_v33, -inf }
  0xa3   : >> { %499 = vmax.xlane.f32.xlu0 %v498_v36  ;;  %v432_v38 = vpop.f32.mrf.mxu0  ;;  %v501_v42 = vsel %vm491_vm2, %v488_v39, -inf }
  0xa5   : >> { %493 = vmax.xlane.f32.xlu1 %v492_v37 }
  0xa7   : >> { %v470_v40 = vpop.f32.mrf.mxu2 }
  0xa8   : >> { %v489_v41 = vpop.f32.mrf.mxu3 }
  0xab   : >> { %502 = vmax.xlane.f32.xlu0 %v501_v42 }
 0x110   : >> { %v497_v43 = vpop.xlane.xlu1 %496 }
 0x111   : >> { %v505_v44 = vsub.f32 %v450_v28, %v497_v43 }
 0x113   : >> { %v510_v45 = vmul.f32 1.442695, %v505_v44 }
 0x115   : >> { %923 = vpow2.f32 %v510_v45 }
 0x116   : >> { %v500_v46 = vpop.xlane.xlu0 %499 }
 0x117   : >> { %v506_v47 = vsub.f32 %v469_v33, %v500_v46 }
 0x118   : >> { %v494_v48 = vpop.xlane.xlu1 %493 }
 0x119   : >> { %v512_v49 = vmul.f32 1.442695, %v506_v47  ;;  %v504_v50 = vsub.f32 %v431_v31, %v494_v48 }
 0x11b   : >> { %v1090_v51 = vpop.eup %923  ;;  %925 = vpow2.f32 %v512_v49  ;;  %v508_v52 = vmul.f32 1.442695, %v504_v50 }
 0x11c   : >> { %v519_v53 = vsel %vm491_vm2, %v1090_v51, 0.0 }
 0x11d   : >> { %927 = vpow2.f32 %v508_v52  ;;  %520 = vadd.xlane.f32.xlu0 %v519_v53 }
 0x11e   : >> { %v503_v54 = vpop.xlane.xlu0 %502 }
 0x11f   : >> { %v507_v55 = vsub.f32 %v488_v39, %v503_v54 }
 0x121   : >> { %v1094_v56 = vpop.eup %925  ;;  %v514_v57 = vmul.f32 1.442695, %v507_v55 }
 0x122   : >> { %v522_v58 = vsel %vm491_vm2, %v1094_v56, 0.0 }
 0x123   : >> { %v1098_v59 = vpop.eup %927  ;;  %929 = vpow2.f32 %v514_v57  ;;  %523 = vadd.xlane.f32.xlu2 %v522_v58 }
 0x124   : >> { %v516_v60 = vsel %vm491_vm2, %v1098_v59, 0.0 }
 0x125   : >> { %517 = vadd.xlane.f32.xlu1 %v516_v60 }
 0x129   : >> { %v1102_v61 = vpop.eup %929 }
 0x12a   : >> { %v525_v62 = vsel %vm491_vm2, %v1102_v61, 0.0 }
 0x12b   : >> { %526 = vadd.xlane.f32.xlu2 %v525_v62 }
 0x190   : >> { %v521_v7 = vpop.xlane.xlu0 %520 }
 0x191   : >> { %931 = vrcp.f32 %v521_v7  ;;  %v554_v13 = vand.u32 2147483648, %v521_v7  ;;  %v552_v15 = vand.u32 2147483647, %v521_v7  ;;  %vm548_vm5 = vweird.f32 %v521_v7 }
 0x193   : >> { %v555_v21 = vor.u32 1.1754944e-38, %v554_v13  ;;  %vm553_vm7 = vcmp.eq.f32.partialorder %v552_v15, 8.507059e+37 }
 0x196   : >> { %v524_v8 = vpop.xlane.xlu2 %523 }
 0x197   : >> { %v932_v9 = vpop.eup %931  ;;  %933 = vrcp.f32 %v524_v8  ;;  %v567_v25 = vand.u32 2147483647, %v524_v8  ;;  %v569_v26 = vand.u32 2147483648, %v524_v8  ;;  %vm563_vm9 = vweird.f32 %v524_v8 }
 0x198   : >> { %v544_v10 = vmul.f32 %v932_v9, %v521_v7  ;;  %v518_v11 = vpop.xlane.xlu1 %517  ;;  %vm549_vm4 = vweird.f32 %v932_v9 }
 0x199   : >> { %935 = vrcp.f32 %v518_v11  ;;  %vm550_vm6 = vmor %vm548_vm5, %vm549_vm4  ;;  %v539_v27 = vand.u32 2147483648, %v518_v11  ;;  %vm533_vm10 = vweird.f32 %v518_v11  ;;  %v537_v32 = vand.u32 2147483647, %v518_v11 }
 0x19a   : >> { %v545_v12 = vsub.f32 1.0, %v544_v10  ;;  %v570_v37 = vor.u32 1.1754944e-38, %v569_v26  ;;  %vm568_vm14 = vcmp.eq.f32.partialorder %v567_v25, 8.507059e+37 }
 0x19b   : >> { %v540_v38 = vor.u32 1.1754944e-38, %v539_v27  ;;  %vm538_vm1 = vcmp.eq.f32.partialorder %v537_v32, 8.507059e+37 }
 0x19c   : >> { %v546_v14 = vmul.f32 %v932_v9, %v545_v12 }
 0x19d   : >> { %v934_v16 = vpop.eup %933 }
 0x19e   : >> { %v547_v17 = vadd.f32 %v932_v9, %v546_v14  ;;  %v559_v18 = vmul.f32 %v934_v16, %v524_v8  ;;  %v527_v19 = vpop.xlane.xlu2 %526  ;;  %vm564_vm8 = vweird.f32 %v934_v16 }
 0x19f   : >> { %v936_v20 = vpop.eup %935  ;;  %937 = vrcp.f32 %v527_v19  ;;  %vm565_vm13 = vmor %vm563_vm9, %vm564_vm8  ;;  %v582_v46 = vand.u32 2147483647, %v527_v19  ;;  %v584_v47 = vand.u32 2147483648, %v527_v19  ;;  %vm578_vm4 = vweird.f32 %v527_v19 }
 0x1a0   : >> { %v551_v22 = vsel %vm550_vm6, %v932_v9, %v547_v17  ;;  %v560_v23 = vsub.f32 1.0, %v559_v18  ;;  %v529_v24 = vmul.f32 %v936_v20, %v518_v11  ;;  %vm534_vm12 = vweird.f32 %v936_v20 }
 0x1a1   : >> { %v556_v28 = vsel %vm553_vm7, %v555_v21, %v551_v22  ;;  %vm535_vm15 = vmor %vm533_vm10, %vm534_vm12  ;;  %vm583_vm6 = vcmp.eq.f32.partialorder %v582_v46, 8.507059e+37  ;;  %vm711_vm7 = vsmask.f32 256  ;;  %vm702_vm8 = vcmask 130048  }
 0x1a2   : >> { %v561_v29 = vmul.f32 %v934_v16, %v560_v23  ;;  %v530_v30 = vsub.f32 1.0, %v529_v24  ;;  %v557_v31 = vmul.f32 %v1090_v51, %v556_v28  ;;  %vm705_vm9 = vcmask 195584   ;;  %v713_v24 = vld [vmem:[%s709_s9] sm:$0x1] }
 0x1a4   : >> { %v562_v33 = vadd.f32 %v934_v16, %v561_v29  ;;  %v531_v34 = vmul.f32 %v936_v20, %v530_v30  ;;  %v589_v35 = vpack.c.bf16 %v557_v31, %v557_v31  ;;  %v671_v53 = vsel %vm491_vm2, %v557_v31, 0.0 }
 0x1a5   : >> { %v938_v36 = vpop.eup %937 }
 0x1a6   : >> { %v566_v39 = vsel %vm565_vm13, %v934_v16, %v562_v33  ;;  %v532_v40 = vadd.f32 %v936_v20, %v531_v34  ;;  %v574_v41 = vmul.f32 %v938_v36, %v527_v19  ;;  %882 = vmatmul.msk.bf16.vlgmr.msrb.gmra.mxu1 %vm592_vm11, %v589_v35  ;;  %vm579_vm3 = vweird.f32 %v938_v36 }
 0x1a7   : >> { %v571_v42 = vsel %vm568_vm14, %v570_v37, %v566_v39  ;;  %vm580_vm5 = vmor %vm578_vm4, %vm579_vm3 }
 0x1a8   : >> { %v536_v43 = vsel %vm535_vm15, %v936_v20, %v532_v40  ;;  %v575_v44 = vsub.f32 1.0, %v574_v41  ;;  %v572_v45 = vmul.f32 %v1094_v56, %v571_v42  ;;  %v585_v56 = vor.u32 1.1754944e-38, %v584_v47 }
 0x1a9   : >> { %v541_v48 = vsel %vm538_vm1, %v540_v38, %v536_v43 }
 0x1aa   : >> { %v576_v49 = vmul.f32 %v938_v36, %v575_v44  ;;  %v590_v50 = vpack.c.bf16 %v572_v45, %v572_v45  ;;  %v542_v51 = vmul.f32 %v1098_v59, %v541_v48  ;;  %v673_v59 = vsel %vm491_vm2, %v572_v45, 0.0 }
 0x1ac   : >> { %v577_v52 = vadd.f32 %v938_v36, %v576_v49  ;;  %883 = vmatmul.msk.bf16.vlgmr.msrb.gmra.mxu2 %vm592_vm11, %v590_v50  ;;  %v588_v54 = vpack.c.bf16 %v542_v51, %v542_v51  ;;  %v670_v55 = vsel %vm491_vm2, %v542_v51, 0.0 }
 0x1ad   : >> { %v672_v57 = vadd.f32 %v671_v53, %v670_v55 }
 0x1ae   : >> { %v581_v58 = vsel %vm580_vm5, %v938_v36, %v577_v52  ;;  %881 = vmatmul.msk.bf16.vlgmr.msrb.gmra.mxu0 %vm592_vm11, %v588_v54 }
 0x1af   : >> { %v586_v60 = vsel %vm583_vm6, %v585_v56, %v581_v58  ;;  %v674_v63 = vadd.f32 %v673_v59, %v672_v57 }
 0x1b0   : >> { %v587_v62 = vmul.f32 %v1102_v61, %v586_v60 }
 0x1b2   : >> { %v591_v0 = vpack.c.bf16 %v587_v62, %v587_v62  ;;  %v675_v1 = vsel %vm491_vm2, %v587_v62, 0.0 }
 0x1b3   : >> { %v676_v2 = vadd.f32 %v675_v1, %v674_v63 }
 0x1b4   : >> { %884 = vmatmul.msk.bf16.vlgmr.msrb.gmra.mxu3 %vm592_vm11, %v591_v0 }
 0x1b5   : >> { %v677_v3 = vmul.f32 0.25, %v676_v2 }
 0x1b7   : >> { %679 = vst.msk [vmem:[%s678_s25] sm:$0x1] %vm491_vm2, %v677_v3  ;;  %vm710_vm2 = vcmask 253952  }
 0x1b8   : >> { %vm712_vm10 = vmand %vm710_vm2, %vm711_vm7 }
 0x223   : >> { %v628_v4 = vpop.f32.mrf.mxu1 }
 0x224   : >> { %v681_v5 = vpack.c.bf16 %v628_v4, %v628_v4 }
 0x226   : >> { %v685_v6 = vunpack.c.l.b16 %v681_v5 }
 0x228   : >> { %v686_v7 = vpack.c.b16 %v685_v6, %v685_v6 }
 0x22a   : >> { %687 = vrot.lane.b32.xlu2 %v686_v7, %s972_s27 }
 0x22b   : >> { %v609_v61 = vpop.f32.mrf.mxu0  ;;  %v630_v8 = vpop.f32.mrf.mxu1 }
 0x22c   : >> { %v680_v21 = vpack.c.bf16 %v609_v61, %v609_v61 }
 0x22f   : >> { %v647_v9 = vpop.f32.mrf.mxu2 }
 0x230   : >> { %v682_v10 = vpack.c.bf16 %v647_v9, %v647_v9 }
 0x232   : >> { %v690_v11 = vunpack.c.l.b16 %v682_v10 }
 0x233   : >> { %v611_v12 = vpop.f32.mrf.mxu0 }
 0x234   : >> { %v691_v13 = vpack.c.b16 %v690_v11, %v690_v11 }
 0x236   : >> { %692 = vrot.lane.b32.xlu0 %v691_v13, %s973_s28 }
 0x237   : >> { %v649_v14 = vpop.f32.mrf.mxu2  ;;  %v666_v15 = vpop.f32.mrf.mxu3 }
 0x238   : >> { %v683_v16 = vpack.c.bf16 %v666_v15, %v666_v15 }
 0x23a   : >> { %v695_v17 = vunpack.c.l.b16 %v683_v16 }
 0x23c   : >> { %v696_v18 = vpack.c.b16 %v695_v17, %v695_v17 }
 0x23e   : >> { %697 = vrot.lane.b32.xlu1 %v696_v18, %s974_s30 }
 0x23f   : >> { %v668_v19 = vpop.f32.mrf.mxu3 }
 0x284   : >> { %v688_v20 = vpop.permute.xlu2 %687 }
 0x285   : >> { %v701_v23 = vsel %vm414_vm0, %v680_v21, %v688_v20 }
 0x2a8   : >> { %v693_v22 = vpop.permute.xlu0 %692 }
 0x2a9   : >> { %v704_v25 = vsel %vm702_vm8, %v701_v23, %v693_v22 }
 0x2af   : > { %380 = sbr.rel (!%p378_p5) target bundleno = 17 (0x11), region = 100 }
 0x2b0   : >> { %v698_v26 = vpop.permute.xlu1 %697 }
 0x2b1   : >> { %v707_v27 = vsel %vm705_vm9, %v704_v25, %v698_v26 }
 0x2b2   : >> { %v714_v28 = vsel %vm712_vm10, %v707_v27, %v713_v24 }
 0x2b3   : >> { %715 = vst [vmem:[%s709_s9] sm:$0x1] %v714_v28 }
 0x2b4 PF: > { %s16_s20 = sadd.s32 1, %s965_s20   ;;  %s1157_s18 = smov %s961_s19 }
 0x2b5   : > { %p13_p6 = scmp.ge.s32.totalorder %s16_s20, 4   ;;  %s1158_s19 = smov %s1160_s21 }
 0x2b7   :  { %15 = sbr.rel (!%p13_p6) target bundleno = 2 (0x2), region = 111 }

</bundles_post_ra>
